<compile_context>
chip_gen: v6e
topology: v6e:2x2x1
jax: 0.10.0
libtpu: 0.0.40
codegen_flags: <defaults>
</compile_context>

<pallas_src>
import math
import functools

import jax
import jax.numpy as jnp
from jax.experimental import pallas as pl
from jax.experimental.pallas import tpu as pltpu


def _mhca_kernel(x_ref, y_ref, mask_ref,
                 wk_ref, bk_ref, wv_ref, bv_ref, wq_ref, bq_ref, wo_ref, bo_ref,
                 out_ref,
                 k_scratch, v_scratch, q_scratch, vals_scratch,
                 *, num_heads, head_dim):
    """Grid = (batch, query_tile). x_ref: (S, D); y_ref/out_ref: (block_q, D)."""
    H, hd = num_heads, head_dim

    # ---- K/V projection: once per batch element, cached head-major in VMEM ----
    @pl.when(pl.program_id(1) == 0)
    def _():
        x = x_ref[...]                                            # (S, D), native dtype
        k = jnp.dot(x, wk_ref[...], preferred_element_type=jnp.float32) + bk_ref[...]
        v = jnp.dot(x, wv_ref[...], preferred_element_type=jnp.float32) + bv_ref[...]
        k = k.astype(k_scratch.dtype)
        v = v.astype(v_scratch.dtype)
        # Contiguous (de-interleaved) head slices -> head-major scratch. Pure data
        # movement, done once per batch element (not in the per-tile hot path).
        for h in range(H):
            k_scratch[h] = k[:, h * hd:(h + 1) * hd]
            v_scratch[h] = v[:, h * hd:(h + 1) * hd]

    # ---- Q projection for this query tile (1/sqrt(hd) pre-folded into wq/bq) ----
    y = y_ref[...]                                                # (block_q, D)
    q = jnp.dot(y, wq_ref[...], preferred_element_type=jnp.float32) + bq_ref[...]
    q = q.astype(q_scratch.dtype)
    for h in range(H):
        q_scratch[h] = q[:, h * hd:(h + 1) * hd]

    qh = q_scratch[...]                                           # (H, block_q, hd)
    kh = k_scratch[...]                                           # (H, S, hd)
    vh = v_scratch[...]                                           # (H, S, hd)

    # ---- Attention: all heads batched in single MXU calls ----
    scores = jnp.einsum('hqd,hkd->hqk', qh, kh,
                        preferred_element_type=jnp.float32)       # (H, block_q, S)
    scores = scores + mask_ref[...][None, :, :].astype(jnp.float32)
    scores = scores - jnp.max(scores, axis=-1, keepdims=True)     # stable softmax (f32)
    p = jnp.exp(scores)
    attn = p * pl.reciprocal(jnp.sum(p, axis=-1, keepdims=True), approx=True)
    vals = jnp.einsum('hqk,hkd->hqd', attn.astype(vh.dtype), vh,
                      preferred_element_type=jnp.float32)         # (H, block_q, hd)

    # ---- Merge heads into a lane-dense (block_q, D) slab, then output proj ----
    for h in range(H):
        vals_scratch[:, h * hd:(h + 1) * hd] = vals[h]
    values = vals_scratch[...].astype(wo_ref.dtype)               # (block_q, D)

    out = jnp.dot(values, wo_ref[...], preferred_element_type=jnp.float32) + bo_ref[...]
    out_ref[...] = out.astype(out_ref.dtype)


def multi_head_cross_attention(x, y, mask, params, num_heads, *, block_q=None):
    """x, y: (B, S, D); mask: (S, S) broadcast over heads and batch.

    params = (W_kv (D,2D), b_kv (1,2D), W_q (D,D), b_q (1,D), W_o (D,D), b_o (1,D)),
    with PyTorch's interleaved per-head [k_h | v_h] packing of the KV output features.
    """
    B, S, D = x.shape
    assert D % num_heads == 0
    head_dim = D // num_heads
    wkv, bkv, wq, bq, wo, bo = params

    # ---------------- wrapper-side parameter prep (outside the kernel) -------------
    # De-interleave KV: output feature f = h*2*hd + c*hd + e  (c=0 -> K, c=1 -> V).
    wkv_r = wkv.reshape(D, num_heads, 2, head_dim)
    wk = wkv_r[:, :, 0, :].reshape(D, D)
    wv = wkv_r[:, :, 1, :].reshape(D, D)
    bkv_r = bkv.reshape(num_heads, 2, head_dim)
    bk = bkv_r[:, 0, :].reshape(1, D)
    bv = bkv_r[:, 1, :].reshape(1, D)

    # Fold the 1/sqrt(head_dim) attention scale into the query projection.
    scale = 1.0 / math.sqrt(head_dim)
    wq_s = (wq * scale).astype(wq.dtype)
    bq_s = (bq * scale).astype(bq.dtype)

    # ---------------- query tiling ------------------------------------------------
    if block_q is None:
        if S <= 512:
            block_q = S
        elif S % 512 == 0:
            block_q = 512
        else:
            block_q = S  # TODO(synk): pick a divisor of S that is a multiple of 8
    if block_q != S and (S % block_q != 0 or block_q % 8 != 0):
        block_q = S
    num_q_tiles = S // block_q

    # ---------------- explicit VMEM budget -----------------------------------------
    def _pad(n, m):
        return ((n + m - 1) // m) * m

    isz = x.dtype.itemsize
    msz = mask.dtype.itemsize
    d_p, s_p, bq_p = _pad(D, 128), _pad(S, 8), _pad(block_q, 8)
    sl_p, hd_p = _pad(S, 128), _pad(head_dim, 128)
    est = (
        2 * s_p * d_p * isz                                  # x block (double-buffered)
        + 4 * bq_p * d_p * isz                               # y + out blocks
        + 2 * bq_p * sl_p * msz                              # mask block
        + 2 * (4 * _pad(D, 8) * d_p + 4 * 8 * d_p) * isz     # weights + biases
        + (2 * num_heads * s_p + num_heads * bq_p) * hd_p * isz   # k/v/q scratch
        + bq_p * d_p * 4                                     # vals scratch (f32)
        + 4 * num_heads * bq_p * sl_p * 4                    # scores/exp/attn f32 temps
    )
    vmem_limit = int(min(max(2 * est, 32 * 1024 * 1024), 64 * 1024 * 1024))

    kernel = functools.partial(_mhca_kernel, num_heads=num_heads, head_dim=head_dim)

    return pl.pallas_call(
        kernel,
        out_shape=jax.ShapeDtypeStruct((B, S, D), x.dtype),
        grid_spec=pltpu.PrefetchScalarGridSpec(
            num_scalar_prefetch=0,
            grid=(B, num_q_tiles),
            in_specs=[
                pl.BlockSpec((None, S, D), lambda b, t: (b, 0, 0)),        # x (K/V source)
                pl.BlockSpec((None, block_q, D), lambda b, t: (b, t, 0)),  # y (query tile)
                pl.BlockSpec((block_q, S), lambda b, t: (t, 0)),           # mask rows
                pl.BlockSpec((D, D), lambda b, t: (0, 0)),                 # W_k
                pl.BlockSpec((1, D), lambda b, t: (0, 0)),                 # b_k
                pl.BlockSpec((D, D), lambda b, t: (0, 0)),                 # W_v
                pl.BlockSpec((1, D), lambda b, t: (0, 0)),                 # b_v
                pl.BlockSpec((D, D), lambda b, t: (0, 0)),                 # W_q (pre-scaled)
                pl.BlockSpec((1, D), lambda b, t: (0, 0)),                 # b_q (pre-scaled)
                pl.BlockSpec((D, D), lambda b, t: (0, 0)),                 # W_o
                pl.BlockSpec((1, D), lambda b, t: (0, 0)),                 # b_o
            ],
            out_specs=pl.BlockSpec((None, block_q, D), lambda b, t: (b, t, 0)),
            scratch_shapes=[
                pltpu.VMEM((num_heads, S, head_dim), x.dtype),        # K, head-major
                pltpu.VMEM((num_heads, S, head_dim), x.dtype),        # V, head-major
                pltpu.VMEM((num_heads, block_q, head_dim), x.dtype),  # Q, head-major
                pltpu.VMEM((block_q, D), jnp.float32),                # merged head values
            ],
        ),
        compiler_params=pltpu.CompilerParams(
            dimension_semantics=("parallel", "arbitrary"),
            vmem_limit_bytes=vmem_limit,
        ),
    )(x, y, mask, wk, bk, wv, bv, wq_s, bq_s, wo, bo)


def _init_linear(key, in_f, out_f):
    """Deterministic PyTorch-style Linear init; weight stored as (in_f, out_f)."""
    kw, kb = jax.random.split(key)
    bound = 1.0 / math.sqrt(in_f)
    w = jax.random.uniform(kw, (in_f, out_f), jnp.float32, -bound, bound)
    b = jax.random.uniform(kb, (1, out_f), jnp.float32, -bound, bound)
    return w, b


def _reference(x, y, mask, params, num_heads):
    """Plain-JAX reference mirroring the PyTorch forward, for verification."""
    wkv, bkv, wq, bq, wo, bo = params
    B, S, D = x.shape
    hd = D // num_heads
    kv = x @ wkv + bkv                                               # (B, S, 2D)
    q = y @ wq + bq                                                  # (B, S, D)
    kv = kv.reshape(B, S, num_heads, 2 * hd).transpose(0, 2, 1, 3)   # (B, H, S, 2hd)
    q = q.reshape(B, S, num_heads, hd).transpose(0, 2, 1, 3)         # (B, H, S, hd)
    k, v = kv[..., :hd], kv[..., hd:]
    scaled = jnp.einsum("bhsd,bhtd->bhst", q, k) / math.sqrt(hd)
    scaled = scaled + mask                                           # (S,S) broadcasts
    attn = jax.nn.softmax(scaled, axis=-1)
    vals = jnp.einsum("bhst,bhtd->bhsd", attn, v)
    vals = vals.transpose(0, 2, 1, 3).reshape(B, S, D)
    return vals @ wo + bo


if __name__ == "__main__":
    B, S, D, H = 2, 16, 32, 4

    key = jax.random.PRNGKey(0)
    k_x, k_y, k_m, k_kv, k_q, k_o = jax.random.split(key, 6)

    x = jax.random.normal(k_x, (B, S, D), jnp.float32)
    y = jax.random.normal(k_y, (B, S, D), jnp.float32)
    mask = jax.random.normal(k_m, (S, S), jnp.float32) * 0.1

    wkv, bkv = _init_linear(k_kv, D, 2 * D)
    wq, bq = _init_linear(k_q, D, D)
    wo, bo = _init_linear(k_o, D, D)
    params = (wkv, bkv, wq, bq, wo, bo)

    # block_q=8 < S exercises the query-tile grid axis and the cached-KV path
    # (grid = (B, 2)); correctness is checked against the plain-JAX reference.
    out = multi_head_cross_attention(x, y, mask, params, H, block_q=8)
    out = jax.block_until_ready(out)

    ref = _reference(x, y, mask, params, H)
    assert out.shape == (B, S, D)
    max_err = float(jnp.max(jnp.abs(out - ref)))
    assert jnp.allclose(out, ref, atol=2e-3, rtol=2e-3), (
        f"mismatch vs reference (max abs err {max_err})")

    print("KERNEL_OK")
</pallas_src>

<mosaic_0001>
module attributes {stable_mosaic.version = 11 : i64} {
  func.func @_mhca_kernel(%arg0: i32, %arg1: i32, %arg2: memref<1x16x32xf32, #tpu.memory_space<vmem>>, %arg3: memref<1x8x32xf32, #tpu.memory_space<vmem>>, %arg4: memref<8x16xf32, #tpu.memory_space<vmem>>, %arg5: memref<32x32xf32, #tpu.memory_space<vmem>>, %arg6: memref<1x32xf32, #tpu.memory_space<vmem>>, %arg7: memref<32x32xf32, #tpu.memory_space<vmem>>, %arg8: memref<1x32xf32, #tpu.memory_space<vmem>>, %arg9: memref<32x32xf32, #tpu.memory_space<vmem>>, %arg10: memref<1x32xf32, #tpu.memory_space<vmem>>, %arg11: memref<32x32xf32, #tpu.memory_space<vmem>>, %arg12: memref<1x32xf32, #tpu.memory_space<vmem>>, %arg13: memref<1x8x32xf32, #tpu.memory_space<vmem>>, %arg14: memref<4x16x8xf32, #tpu.memory_space<vmem>>, %arg15: memref<4x16x8xf32, #tpu.memory_space<vmem>>, %arg16: memref<4x8x8xf32, #tpu.memory_space<vmem>>, %arg17: memref<8x32xf32, #tpu.memory_space<vmem>>) attributes {dimension_semantics = [#tpu.dimension_semantics<parallel>, #tpu.dimension_semantics<arbitrary>], iteration_bounds = array<i64: 2, 2>, scalar_prefetch = 0 : i64, scratch_operands = 4 : i64, tpu.core_type = #tpu.core_type<tc>, window_params = [{transform_indices = @transform_0, window_bounds = array<i64: 1, 16, 32>}, {transform_indices = @transform_1, window_bounds = array<i64: 1, 8, 32>}, {transform_indices = @transform_2, window_bounds = array<i64: 8, 16>}, {pipeline_mode = #tpu.pipeline_mode<synchronous>, transform_indices = @transform_3, window_bounds = array<i64: 32, 32>}, {pipeline_mode = #tpu.pipeline_mode<synchronous>, transform_indices = @transform_4, window_bounds = array<i64: 1, 32>}, {pipeline_mode = #tpu.pipeline_mode<synchronous>, transform_indices = @transform_5, window_bounds = array<i64: 32, 32>}, {pipeline_mode = #tpu.pipeline_mode<synchronous>, transform_indices = @transform_6, window_bounds = array<i64: 1, 32>}, {pipeline_mode = #tpu.pipeline_mode<synchronous>, transform_indices = @transform_7, window_bounds = array<i64: 32, 32>}, {pipeline_mode = #tpu.pipeline_mode<synchronous>, transform_indices = @transform_8, window_bounds = array<i64: 1, 32>}, {pipeline_mode = #tpu.pipeline_mode<synchronous>, transform_indices = @transform_9, window_bounds = array<i64: 32, 32>}, {pipeline_mode = #tpu.pipeline_mode<synchronous>, transform_indices = @transform_10, window_bounds = array<i64: 1, 32>}, {transform_indices = @transform_11, window_bounds = array<i64: 1, 8, 32>}]} {
    %c0_i32 = arith.constant 0 : i32
    %0 = arith.cmpi eq, %arg1, %c0_i32 : i32
    %1 = arith.extui %0 : i1 to i32
    %c0_i32_0 = arith.constant 0 : i32
    %2 = arith.cmpi ne, %1, %c0_i32_0 : i32
    scf.if %2 {
      %c0_46 = arith.constant 0 : index
      %c0_47 = arith.constant 0 : index
      %c0_48 = arith.constant 0 : index
      %66 = vector.load %arg2[%c0_46, %c0_47, %c0_48] : memref<1x16x32xf32, #tpu.memory_space<vmem>>, vector<1x16x32xf32>
      %67 = vector.shape_cast %66 : vector<1x16x32xf32> to vector<16x32xf32>
      %c0_49 = arith.constant 0 : index
      %c0_50 = arith.constant 0 : index
      %68 = vector.load %arg5[%c0_49, %c0_50] : memref<32x32xf32, #tpu.memory_space<vmem>>, vector<32x32xf32>
      %cst_51 = arith.constant dense<0.000000e+00> : vector<16x32xf32>
      %69 = tpu.matmul %67, %68, %cst_51 {dimension_numbers = #tpu.dot_dimension_numbers<[1], [0], [0], [1], [0, 0, 1, 1], [], []>} : vector<16x32xf32>, vector<32x32xf32>, vector<16x32xf32> -> vector<16x32xf32>
      %c0_52 = arith.constant 0 : index
      %c0_53 = arith.constant 0 : index
      %70 = vector.load %arg6[%c0_52, %c0_53] : memref<1x32xf32, #tpu.memory_space<vmem>>, vector<1x32xf32>
      %71 = vector.broadcast %70 : vector<1x32xf32> to vector<16x32xf32>
      %72 = arith.addf %69, %71 : vector<16x32xf32>
      %c0_54 = arith.constant 0 : index
      %c0_55 = arith.constant 0 : index
      %73 = vector.load %arg7[%c0_54, %c0_55] : memref<32x32xf32, #tpu.memory_space<vmem>>, vector<32x32xf32>
      %cst_56 = arith.constant dense<0.000000e+00> : vector<16x32xf32>
      %74 = tpu.matmul %67, %73, %cst_56 {dimension_numbers = #tpu.dot_dimension_numbers<[1], [0], [0], [1], [0, 0, 1, 1], [], []>} : vector<16x32xf32>, vector<32x32xf32>, vector<16x32xf32> -> vector<16x32xf32>
      %c0_57 = arith.constant 0 : index
      %c0_58 = arith.constant 0 : index
      %75 = vector.load %arg8[%c0_57, %c0_58] : memref<1x32xf32, #tpu.memory_space<vmem>>, vector<1x32xf32>
      %76 = vector.broadcast %75 : vector<1x32xf32> to vector<16x32xf32>
      %77 = arith.addf %74, %76 : vector<16x32xf32>
      %78 = vector.extract_strided_slice %72 {offsets = [0, 0], sizes = [16, 8], strides = [1, 1]} : vector<16x32xf32> to vector<16x8xf32>
      %c0_59 = arith.constant 0 : index
      %c0_60 = arith.constant 0 : index
      %c0_61 = arith.constant 0 : index
      %79 = vector.load %arg14[%c0_59, %c0_60, %c0_61] : memref<4x16x8xf32, #tpu.memory_space<vmem>>, vector<1x16x8xf32>
      %80 = vector.shape_cast %79 : vector<1x16x8xf32> to vector<16x8xf32>
      %81 = vector.shape_cast %78 : vector<16x8xf32> to vector<1x16x8xf32>
      tpu.vector_store %arg14[%c0_59, %c0_60, %c0_61], %81 {strides = array<i32>} : memref<4x16x8xf32, #tpu.memory_space<vmem>>, vector<1x16x8xf32>,
      %82 = vector.extract_strided_slice %77 {offsets = [0, 0], sizes = [16, 8], strides = [1, 1]} : vector<16x32xf32> to vector<16x8xf32>
      %c0_62 = arith.constant 0 : index
      %c0_63 = arith.constant 0 : index
      %c0_64 = arith.constant 0 : index
      %83 = vector.load %arg15[%c0_62, %c0_63, %c0_64] : memref<4x16x8xf32, #tpu.memory_space<vmem>>, vector<1x16x8xf32>
      %84 = vector.shape_cast %83 : vector<1x16x8xf32> to vector<16x8xf32>
      %85 = vector.shape_cast %82 : vector<16x8xf32> to vector<1x16x8xf32>
      tpu.vector_store %arg15[%c0_62, %c0_63, %c0_64], %85 {strides = array<i32>} : memref<4x16x8xf32, #tpu.memory_space<vmem>>, vector<1x16x8xf32>,
      %86 = vector.extract_strided_slice %72 {offsets = [0, 8], sizes = [16, 8], strides = [1, 1]} : vector<16x32xf32> to vector<16x8xf32>
      %c1_65 = arith.constant 1 : index
      %c0_66 = arith.constant 0 : index
      %c0_67 = arith.constant 0 : index
      %87 = vector.load %arg14[%c1_65, %c0_66, %c0_67] : memref<4x16x8xf32, #tpu.memory_space<vmem>>, vector<1x16x8xf32>
      %88 = vector.shape_cast %87 : vector<1x16x8xf32> to vector<16x8xf32>
      %89 = vector.shape_cast %86 : vector<16x8xf32> to vector<1x16x8xf32>
      tpu.vector_store %arg14[%c1_65, %c0_66, %c0_67], %89 {strides = array<i32>} : memref<4x16x8xf32, #tpu.memory_space<vmem>>, vector<1x16x8xf32>,
      %90 = vector.extract_strided_slice %77 {offsets = [0, 8], sizes = [16, 8], strides = [1, 1]} : vector<16x32xf32> to vector<16x8xf32>
      %c1_68 = arith.constant 1 : index
      %c0_69 = arith.constant 0 : index
      %c0_70 = arith.constant 0 : index
      %91 = vector.load %arg15[%c1_68, %c0_69, %c0_70] : memref<4x16x8xf32, #tpu.memory_space<vmem>>, vector<1x16x8xf32>
      %92 = vector.shape_cast %91 : vector<1x16x8xf32> to vector<16x8xf32>
      %93 = vector.shape_cast %90 : vector<16x8xf32> to vector<1x16x8xf32>
      tpu.vector_store %arg15[%c1_68, %c0_69, %c0_70], %93 {strides = array<i32>} : memref<4x16x8xf32, #tpu.memory_space<vmem>>, vector<1x16x8xf32>,
      %94 = vector.extract_strided_slice %72 {offsets = [0, 16], sizes = [16, 8], strides = [1, 1]} : vector<16x32xf32> to vector<16x8xf32>
      %c2_71 = arith.constant 2 : index
      %c0_72 = arith.constant 0 : index
      %c0_73 = arith.constant 0 : index
      %95 = vector.load %arg14[%c2_71, %c0_72, %c0_73] : memref<4x16x8xf32, #tpu.memory_space<vmem>>, vector<1x16x8xf32>
      %96 = vector.shape_cast %95 : vector<1x16x8xf32> to vector<16x8xf32>
      %97 = vector.shape_cast %94 : vector<16x8xf32> to vector<1x16x8xf32>
      tpu.vector_store %arg14[%c2_71, %c0_72, %c0_73], %97 {strides = array<i32>} : memref<4x16x8xf32, #tpu.memory_space<vmem>>, vector<1x16x8xf32>,
      %98 = vector.extract_strided_slice %77 {offsets = [0, 16], sizes = [16, 8], strides = [1, 1]} : vector<16x32xf32> to vector<16x8xf32>
      %c2_74 = arith.constant 2 : index
      %c0_75 = arith.constant 0 : index
      %c0_76 = arith.constant 0 : index
      %99 = vector.load %arg15[%c2_74, %c0_75, %c0_76] : memref<4x16x8xf32, #tpu.memory_space<vmem>>, vector<1x16x8xf32>
      %100 = vector.shape_cast %99 : vector<1x16x8xf32> to vector<16x8xf32>
      %101 = vector.shape_cast %98 : vector<16x8xf32> to vector<1x16x8xf32>
      tpu.vector_store %arg15[%c2_74, %c0_75, %c0_76], %101 {strides = array<i32>} : memref<4x16x8xf32, #tpu.memory_space<vmem>>, vector<1x16x8xf32>,
      %102 = vector.extract_strided_slice %72 {offsets = [0, 24], sizes = [16, 8], strides = [1, 1]} : vector<16x32xf32> to vector<16x8xf32>
      %c3_77 = arith.constant 3 : index
      %c0_78 = arith.constant 0 : index
      %c0_79 = arith.constant 0 : index
      %103 = vector.load %arg14[%c3_77, %c0_78, %c0_79] : memref<4x16x8xf32, #tpu.memory_space<vmem>>, vector<1x16x8xf32>
      %104 = vector.shape_cast %103 : vector<1x16x8xf32> to vector<16x8xf32>
      %105 = vector.shape_cast %102 : vector<16x8xf32> to vector<1x16x8xf32>
      tpu.vector_store %arg14[%c3_77, %c0_78, %c0_79], %105 {strides = array<i32>} : memref<4x16x8xf32, #tpu.memory_space<vmem>>, vector<1x16x8xf32>,
      %106 = vector.extract_strided_slice %77 {offsets = [0, 24], sizes = [16, 8], strides = [1, 1]} : vector<16x32xf32> to vector<16x8xf32>
      %c3_80 = arith.constant 3 : index
      %c0_81 = arith.constant 0 : index
      %c0_82 = arith.constant 0 : index
      %107 = vector.load %arg15[%c3_80, %c0_81, %c0_82] : memref<4x16x8xf32, #tpu.memory_space<vmem>>, vector<1x16x8xf32>
      %108 = vector.shape_cast %107 : vector<1x16x8xf32> to vector<16x8xf32>
      %109 = vector.shape_cast %106 : vector<16x8xf32> to vector<1x16x8xf32>
      tpu.vector_store %arg15[%c3_80, %c0_81, %c0_82], %109 {strides = array<i32>} : memref<4x16x8xf32, #tpu.memory_space<vmem>>, vector<1x16x8xf32>,
    } else {
    }
    %c0 = arith.constant 0 : index
    %c0_1 = arith.constant 0 : index
    %c0_2 = arith.constant 0 : index
    %3 = vector.load %arg3[%c0, %c0_1, %c0_2] : memref<1x8x32xf32, #tpu.memory_space<vmem>>, vector<1x8x32xf32>
    %4 = vector.shape_cast %3 : vector<1x8x32xf32> to vector<8x32xf32>
    %c0_3 = arith.constant 0 : index
    %c0_4 = arith.constant 0 : index
    %5 = vector.load %arg9[%c0_3, %c0_4] : memref<32x32xf32, #tpu.memory_space<vmem>>, vector<32x32xf32>
    %cst = arith.constant dense<0.000000e+00> : vector<8x32xf32>
    %6 = tpu.matmul %4, %5, %cst {dimension_numbers = #tpu.dot_dimension_numbers<[1], [0], [0], [1], [0, 0, 1, 1], [], []>} : vector<8x32xf32>, vector<32x32xf32>, vector<8x32xf32> -> vector<8x32xf32>
    %c0_5 = arith.constant 0 : index
    %c0_6 = arith.constant 0 : index
    %7 = vector.load %arg10[%c0_5, %c0_6] : memref<1x32xf32, #tpu.memory_space<vmem>>, vector<1x32xf32>
    %8 = vector.broadcast %7 : vector<1x32xf32> to vector<8x32xf32>
    %9 = arith.addf %6, %8 : vector<8x32xf32>
    %10 = vector.extract_strided_slice %9 {offsets = [0, 0], sizes = [8, 8], strides = [1, 1]} : vector<8x32xf32> to vector<8x8xf32>
    %c0_7 = arith.constant 0 : index
    %c0_8 = arith.constant 0 : index
    %c0_9 = arith.constant 0 : index
    %11 = vector.load %arg16[%c0_7, %c0_8, %c0_9] : memref<4x8x8xf32, #tpu.memory_space<vmem>>, vector<1x8x8xf32>
    %12 = vector.shape_cast %11 : vector<1x8x8xf32> to vector<8x8xf32>
    %13 = vector.shape_cast %10 : vector<8x8xf32> to vector<1x8x8xf32>
    tpu.vector_store %arg16[%c0_7, %c0_8, %c0_9], %13 {strides = array<i32>} : memref<4x8x8xf32, #tpu.memory_space<vmem>>, vector<1x8x8xf32>,
    %14 = vector.extract_strided_slice %9 {offsets = [0, 8], sizes = [8, 8], strides = [1, 1]} : vector<8x32xf32> to vector<8x8xf32>
    %c1 = arith.constant 1 : index
    %c0_10 = arith.constant 0 : index
    %c0_11 = arith.constant 0 : index
    %15 = vector.load %arg16[%c1, %c0_10, %c0_11] : memref<4x8x8xf32, #tpu.memory_space<vmem>>, vector<1x8x8xf32>
    %16 = vector.shape_cast %15 : vector<1x8x8xf32> to vector<8x8xf32>
    %17 = vector.shape_cast %14 : vector<8x8xf32> to vector<1x8x8xf32>
    tpu.vector_store %arg16[%c1, %c0_10, %c0_11], %17 {strides = array<i32>} : memref<4x8x8xf32, #tpu.memory_space<vmem>>, vector<1x8x8xf32>,
    %18 = vector.extract_strided_slice %9 {offsets = [0, 16], sizes = [8, 8], strides = [1, 1]} : vector<8x32xf32> to vector<8x8xf32>
    %c2 = arith.constant 2 : index
    %c0_12 = arith.constant 0 : index
    %c0_13 = arith.constant 0 : index
    %19 = vector.load %arg16[%c2, %c0_12, %c0_13] : memref<4x8x8xf32, #tpu.memory_space<vmem>>, vector<1x8x8xf32>
    %20 = vector.shape_cast %19 : vector<1x8x8xf32> to vector<8x8xf32>
    %21 = vector.shape_cast %18 : vector<8x8xf32> to vector<1x8x8xf32>
    tpu.vector_store %arg16[%c2, %c0_12, %c0_13], %21 {strides = array<i32>} : memref<4x8x8xf32, #tpu.memory_space<vmem>>, vector<1x8x8xf32>,
    %22 = vector.extract_strided_slice %9 {offsets = [0, 24], sizes = [8, 8], strides = [1, 1]} : vector<8x32xf32> to vector<8x8xf32>
    %c3 = arith.constant 3 : index
    %c0_14 = arith.constant 0 : index
    %c0_15 = arith.constant 0 : index
    %23 = vector.load %arg16[%c3, %c0_14, %c0_15] : memref<4x8x8xf32, #tpu.memory_space<vmem>>, vector<1x8x8xf32>
    %24 = vector.shape_cast %23 : vector<1x8x8xf32> to vector<8x8xf32>
    %25 = vector.shape_cast %22 : vector<8x8xf32> to vector<1x8x8xf32>
    tpu.vector_store %arg16[%c3, %c0_14, %c0_15], %25 {strides = array<i32>} : memref<4x8x8xf32, #tpu.memory_space<vmem>>, vector<1x8x8xf32>,
    %c0_16 = arith.constant 0 : index
    %c0_17 = arith.constant 0 : index
    %c0_18 = arith.constant 0 : index
    %26 = vector.load %arg16[%c0_16, %c0_17, %c0_18] : memref<4x8x8xf32, #tpu.memory_space<vmem>>, vector<4x8x8xf32>
    %c0_19 = arith.constant 0 : index
    %c0_20 = arith.constant 0 : index
    %c0_21 = arith.constant 0 : index
    %27 = vector.load %arg14[%c0_19, %c0_20, %c0_21] : memref<4x16x8xf32, #tpu.memory_space<vmem>>, vector<4x16x8xf32>
    %c0_22 = arith.constant 0 : index
    %c0_23 = arith.constant 0 : index
    %c0_24 = arith.constant 0 : index
    %28 = vector.load %arg15[%c0_22, %c0_23, %c0_24] : memref<4x16x8xf32, #tpu.memory_space<vmem>>, vector<4x16x8xf32>
    "tpu.trace_start"() <{level = 10 : i32, message = "hqd,hkd->hqk"}> : () -> ()
    %cst_25 = arith.constant dense<0.000000e+00> : vector<4x8x16xf32>
    %29 = tpu.matmul %26, %27, %cst_25 {dimension_numbers = #tpu.dot_dimension_numbers<[2], [2], [1], [1], [0, 0, 0, 1, 1, 1], [0], [0]>} : vector<4x8x8xf32>, vector<4x16x8xf32>, vector<4x8x16xf32> -> vector<4x8x16xf32>
    "tpu.trace_stop"() : () -> ()
    %c0_26 = arith.constant 0 : index
    %c0_27 = arith.constant 0 : index
    %30 = vector.load %arg4[%c0_26, %c0_27] : memref<8x16xf32, #tpu.memory_space<vmem>>, vector<8x16xf32>
    %31 = vector.shape_cast %30 : vector<8x16xf32> to vector<1x8x16xf32>
    %32 = vector.broadcast %31 : vector<1x8x16xf32> to vector<4x8x16xf32>
    %33 = arith.addf %29, %32 : vector<4x8x16xf32>
    %cst_28 = arith.constant dense<0xFF800000> : vector<4x8xf32>
    %34 = vector.multi_reduction <maximumf>, %33, %cst_28 [2] : vector<4x8x16xf32> to vector<4x8xf32>
    %35 = vector.shape_cast %34 : vector<4x8xf32> to vector<4x8x1xf32>
    %36 = vector.broadcast %35 : vector<4x8x1xf32> to vector<4x8x16xf32>
    %37 = arith.subf %33, %36 : vector<4x8x16xf32>
    %38 = math.exp %37 : vector<4x8x16xf32>
    %cst_29 = arith.constant dense<0.000000e+00> : vector<4x8xf32>
    %39 = vector.multi_reduction <add>, %38, %cst_29 [2] : vector<4x8x16xf32> to vector<4x8xf32>
    %40 = vector.shape_cast %39 : vector<4x8xf32> to vector<4x8x1xf32>
    %41 = tpu.reciprocal %40 {approx = true} : vector<4x8x1xf32> -> vector<4x8x1xf32>
    %42 = vector.broadcast %41 : vector<4x8x1xf32> to vector<4x8x16xf32>
    %43 = arith.mulf %38, %42 : vector<4x8x16xf32>
    "tpu.trace_start"() <{level = 10 : i32, message = "hqk,hkd->hqd"}> : () -> ()
    %cst_30 = arith.constant dense<0.000000e+00> : vector<4x8x8xf32>
    %44 = tpu.matmul %43, %28, %cst_30 {dimension_numbers = #tpu.dot_dimension_numbers<[2], [1], [1], [2], [0, 0, 0, 1, 1, 2], [0], [0]>} : vector<4x8x16xf32>, vector<4x16x8xf32>, vector<4x8x8xf32> -> vector<4x8x8xf32>
    "tpu.trace_stop"() : () -> ()
    %45 = vector.extract_strided_slice %44 {offsets = [0, 0, 0], sizes = [1, 8, 8], strides = [1, 1, 1]} : vector<4x8x8xf32> to vector<1x8x8xf32>
    %46 = vector.shape_cast %45 : vector<1x8x8xf32> to vector<8x8xf32>
    %c0_31 = arith.constant 0 : index
    %c0_32 = arith.constant 0 : index
    %47 = vector.load %arg17[%c0_31, %c0_32] : memref<8x32xf32, #tpu.memory_space<vmem>>, vector<8x8xf32>
    tpu.vector_store %arg17[%c0_31, %c0_32], %46 {strides = array<i32>} : memref<8x32xf32, #tpu.memory_space<vmem>>, vector<8x8xf32>,
    %48 = vector.extract_strided_slice %44 {offsets = [1, 0, 0], sizes = [1, 8, 8], strides = [1, 1, 1]} : vector<4x8x8xf32> to vector<1x8x8xf32>
    %49 = vector.shape_cast %48 : vector<1x8x8xf32> to vector<8x8xf32>
    %c0_33 = arith.constant 0 : index
    %c8 = arith.constant 8 : index
    %50 = vector.load %arg17[%c0_33, %c8] : memref<8x32xf32, #tpu.memory_space<vmem>>, vector<8x8xf32>
    tpu.vector_store %arg17[%c0_33, %c8], %49 {strides = array<i32>} : memref<8x32xf32, #tpu.memory_space<vmem>>, vector<8x8xf32>,
    %51 = vector.extract_strided_slice %44 {offsets = [2, 0, 0], sizes = [1, 8, 8], strides = [1, 1, 1]} : vector<4x8x8xf32> to vector<1x8x8xf32>
    %52 = vector.shape_cast %51 : vector<1x8x8xf32> to vector<8x8xf32>
    %c0_34 = arith.constant 0 : index
    %c16 = arith.constant 16 : index
    %53 = vector.load %arg17[%c0_34, %c16] : memref<8x32xf32, #tpu.memory_space<vmem>>, vector<8x8xf32>
    tpu.vector_store %arg17[%c0_34, %c16], %52 {strides = array<i32>} : memref<8x32xf32, #tpu.memory_space<vmem>>, vector<8x8xf32>,
    %54 = vector.extract_strided_slice %44 {offsets = [3, 0, 0], sizes = [1, 8, 8], strides = [1, 1, 1]} : vector<4x8x8xf32> to vector<1x8x8xf32>
    %55 = vector.shape_cast %54 : vector<1x8x8xf32> to vector<8x8xf32>
    %c0_35 = arith.constant 0 : index
    %c24 = arith.constant 24 : index
    %56 = vector.load %arg17[%c0_35, %c24] : memref<8x32xf32, #tpu.memory_space<vmem>>, vector<8x8xf32>
    tpu.vector_store %arg17[%c0_35, %c24], %55 {strides = array<i32>} : memref<8x32xf32, #tpu.memory_space<vmem>>, vector<8x8xf32>,
    %c0_36 = arith.constant 0 : index
    %c0_37 = arith.constant 0 : index
    %57 = vector.load %arg17[%c0_36, %c0_37] : memref<8x32xf32, #tpu.memory_space<vmem>>, vector<8x32xf32>
    %c0_38 = arith.constant 0 : index
    %c0_39 = arith.constant 0 : index
    %58 = vector.load %arg11[%c0_38, %c0_39] : memref<32x32xf32, #tpu.memory_space<vmem>>, vector<32x32xf32>
    %cst_40 = arith.constant dense<0.000000e+00> : vector<8x32xf32>
    %59 = tpu.matmul %57, %58, %cst_40 {dimension_numbers = #tpu.dot_dimension_numbers<[1], [0], [0], [1], [0, 0, 1, 1], [], []>} : vector<8x32xf32>, vector<32x32xf32>, vector<8x32xf32> -> vector<8x32xf32>
    %c0_41 = arith.constant 0 : index
    %c0_42 = arith.constant 0 : index
    %60 = vector.load %arg12[%c0_41, %c0_42] : memref<1x32xf32, #tpu.memory_space<vmem>>, vector<1x32xf32>
    %61 = vector.broadcast %60 : vector<1x32xf32> to vector<8x32xf32>
    %62 = arith.addf %59, %61 : vector<8x32xf32>
    %c0_43 = arith.constant 0 : index
    %c0_44 = arith.constant 0 : index
    %c0_45 = arith.constant 0 : index
    %63 = vector.load %arg13[%c0_43, %c0_44, %c0_45] : memref<1x8x32xf32, #tpu.memory_space<vmem>>, vector<1x8x32xf32>
    %64 = vector.shape_cast %63 : vector<1x8x32xf32> to vector<8x32xf32>
    %65 = vector.shape_cast %62 : vector<8x32xf32> to vector<1x8x32xf32>
    tpu.vector_store %arg13[%c0_43, %c0_44, %c0_45], %65 {strides = array<i32>} : memref<1x8x32xf32, #tpu.memory_space<vmem>>, vector<1x8x32xf32>,
    return
  }
  func.func @transform_0(%arg0: i32, %arg1: i32) -> (i32, i32, i32) {
    %c0_i32 = arith.constant 0 : i32
    %c0_i32_0 = arith.constant 0 : i32
    %c0_i32_1 = arith.constant 0 : i32
    return %arg0, %c0_i32, %c0_i32_0 : i32, i32, i32
  }
  func.func @transform_1(%arg0: i32, %arg1: i32) -> (i32, i32, i32) {
    %c0_i32 = arith.constant 0 : i32
    %c0_i32_0 = arith.constant 0 : i32
    return %arg0, %arg1, %c0_i32 : i32, i32, i32
  }
  func.func @transform_2(%arg0: i32, %arg1: i32) -> (i32, i32) {
    %c0_i32 = arith.constant 0 : i32
    %c0_i32_0 = arith.constant 0 : i32
    return %arg1, %c0_i32 : i32, i32
  }
  func.func @transform_3(%arg0: i32, %arg1: i32) -> (i32, i32) {
    %c0_i32 = arith.constant 0 : i32
    %c0_i32_0 = arith.constant 0 : i32
    %c0_i32_1 = arith.constant 0 : i32
    return %c0_i32, %c0_i32_0 : i32, i32
  }
  func.func @transform_4(%arg0: i32, %arg1: i32) -> (i32, i32) {
    %c0_i32 = arith.constant 0 : i32
    %c0_i32_0 = arith.constant 0 : i32
    %c0_i32_1 = arith.constant 0 : i32
    return %c0_i32, %c0_i32_0 : i32, i32
  }
  func.func @transform_5(%arg0: i32, %arg1: i32) -> (i32, i32) {
    %c0_i32 = arith.constant 0 : i32
    %c0_i32_0 = arith.constant 0 : i32
    %c0_i32_1 = arith.constant 0 : i32
    return %c0_i32, %c0_i32_0 : i32, i32
  }
  func.func @transform_6(%arg0: i32, %arg1: i32) -> (i32, i32) {
    %c0_i32 = arith.constant 0 : i32
    %c0_i32_0 = arith.constant 0 : i32
    %c0_i32_1 = arith.constant 0 : i32
    return %c0_i32, %c0_i32_0 : i32, i32
  }
  func.func @transform_7(%arg0: i32, %arg1: i32) -> (i32, i32) {
    %c0_i32 = arith.constant 0 : i32
    %c0_i32_0 = arith.constant 0 : i32
    %c0_i32_1 = arith.constant 0 : i32
    return %c0_i32, %c0_i32_0 : i32, i32
  }
  func.func @transform_8(%arg0: i32, %arg1: i32) -> (i32, i32) {
    %c0_i32 = arith.constant 0 : i32
    %c0_i32_0 = arith.constant 0 : i32
    %c0_i32_1 = arith.constant 0 : i32
    return %c0_i32, %c0_i32_0 : i32, i32
  }
  func.func @transform_9(%arg0: i32, %arg1: i32) -> (i32, i32) {
    %c0_i32 = arith.constant 0 : i32
    %c0_i32_0 = arith.constant 0 : i32
    %c0_i32_1 = arith.constant 0 : i32
    return %c0_i32, %c0_i32_0 : i32, i32
  }
  func.func @transform_10(%arg0: i32, %arg1: i32) -> (i32, i32) {
    %c0_i32 = arith.constant 0 : i32
    %c0_i32_0 = arith.constant 0 : i32
    %c0_i32_1 = arith.constant 0 : i32
    return %c0_i32, %c0_i32_0 : i32, i32
  }
  func.func @transform_11(%arg0: i32, %arg1: i32) -> (i32, i32, i32) {
    %c0_i32 = arith.constant 0 : i32
    %c0_i32_0 = arith.constant 0 : i32
    return %arg0, %arg1, %c0_i32 : i32, i32, i32
  }
}

</mosaic_0001>

<bundles_post_ra>
// kernel: tpu_custom_call.1
= control target key start
LH: loop header
LB: loop body
LE: loop exit
PB: predicated region body
PF: predicated region fallthrough
CT: control target
= control target key end

     0   :  { %s3221_s0 = inlined_call_operand.hbm [shape: f32[2,16,32], index: 0, kind: input, shape index: {}]   ;;  %s3222_s1 = inlined_call_operand.hbm [shape: f32[2,16,32], index: 1, kind: input, shape index: {}]   ;;  %s3223_s2 = inlined_call_operand.hbm [shape: f32[16,16], index: 2, kind: input, shape index: {}]   ;;  %s3224_s3 = inlined_call_operand.hbm [shape: f32[32,32], index: 3, kind: input, shape index: {}]   ;;  %s3225_s4 = inlined_call_operand.vmem [shape: f32[1,32], index: 4, kind: input, shape index: {}]   ;;  %s3226_s5 = inlined_call_operand.hbm [shape: f32[32,32], index: 5, kind: input, shape index: {}]   ;;  %s3227_s6 = inlined_call_operand.vmem [shape: f32[1,32], index: 6, kind: input, shape index: {}]   ;;  %s3228_s7 = inlined_call_operand.hbm [shape: f32[32,32], index: 7, kind: input, shape index: {}]   ;;  %s3229_s8 = inlined_call_operand.vmem [shape: f32[1,32], index: 8, kind: input, shape index: {}]   ;;  %s3230_s9 = inlined_call_operand.hbm [shape: f32[32,32], index: 9, kind: input, shape index: {}]   ;;  %s3231_s10 = inlined_call_operand.vmem [shape: f32[1,32], index: 10, kind: input, shape index: {}]   ;;  %s3232_s11 = inlined_call_operand.hbm [shape: f32[2,16,32], index: 11, kind: output, shape index: {}]  }
   0x1   :  { %3257 = sst [smem:[#allocation38_spill]] %s3221_s0 }
   0x2   :  { %3258 = sst [smem:[#allocation39_spill]] %s3223_s2 }
   0x3   :  { %3259 = sst [smem:[#allocation40_spill]] %s3224_s3 }
   0x4   :  { %3260 = sst [smem:[#allocation41_spill]] %s3225_s4 }
   0x5   :  { %3261 = sst [smem:[#allocation42_spill]] %s3227_s6 }
   0x6   :  { %3262 = sst [smem:[#allocation43_spill]] %s3228_s7 }
   0x7   :  { %3263 = sst [smem:[#allocation44_spill]] %s3229_s8 }
   0x8   :  { %3264 = sst [smem:[#allocation45_spill]] %s3231_s10 }
   0x9   :  { %3265 = sst [smem:[#allocation46_spill]] %s3232_s11 }
   0xa   :  { %16 = vsyncpa [#allocation7], 0 }
   0xb   :  { %18 = vsyncpa [#allocation7 + $0x1], 0 }
   0xc   :  { %19 = vsyncpa [#allocation10], 0 }
   0xd   :  { %21 = vsyncpa [#allocation10 + $0x1], 0 }
   0xe   :  { %22 = vsyncpa [#allocation13], 0 }
   0xf   :  { %23 = vsyncpa [#allocation16], 0 }
  0x10   :  { %24 = vsyncpa [#allocation8], 0 }
  0x11   :  { %26 = vsyncpa [#allocation8 + $0x1], 0  ;;  %s2706_s17 = smov 0   ;;  %s2708_s18 = smov 0  }
  0x12   :  { %s2710_s19 = smov 0   ;;  %s2712_s20 = smov 0  }
  0x13   :  { %s2714_s21 = smov 0   ;;  %s2716_s22 = smov 0  }
  0x14   :  { %s2718_s23 = smov 0   ;;  %s2720_s24 = smov 0  }
  0x15   :  { %s2722_s25 = smov 0   ;;  %s2724_s26 = smov 0  }
  0x16   :  { %s2726_s27 = smov 0   ;;  %s2728_s28 = smov 0  }
  0x17   :  { %s2730_s29 = smov 0   ;;  %s2732_s30 = smov 0  }
  0x18 LB: > { %3266 = sst [smem:[#allocation25_spill]] %s2571_s17  ;;  %s2777_s12 = sadd.s32 4294967295, %s2623_s30   ;;  %s2623_s30 = sphi %s2732_s30, %s32_s30   ;;  %s2619_s29 = sphi %s2730_s29, %s3347_s29   ;;  %s2615_s28 = sphi %s2728_s28, %s3346_s28   ;;  %s2611_s27 = sphi %s2726_s27, %s3345_s27   ;;  %s2607_s26 = sphi %s2724_s26, %s3344_s26   ;;  %s2603_s25 = sphi %s2722_s25, %s3343_s25   ;;  %s2599_s24 = sphi %s2720_s24, %s3342_s24   ;;  %s2595_s23 = sphi %s2718_s23, %s3341_s23   ;;  %s2591_s22 = sphi %s2716_s22, %s3340_s22   ;;  %s2587_s21 = sphi %s2714_s21, %s3339_s21   ;;  %s2583_s20 = sphi %s2712_s20, %s3332_s20   ;;  %s2579_s19 = sphi %s2710_s19, %s3338_s19   ;;  %s2575_s18 = sphi %s2708_s18, %s3337_s18   ;;  %s2571_s17 = sphi %s2706_s17, %s3336_s17  }
  0x19   : > { %3267 = sst [smem:[#allocation26_spill]] %s2583_s20  ;;  %p1867_p0 = scmp.ge.s32.totalorder %s2623_s30, 1 }
  0x1a   : > { %3268 = sst [smem:[#allocation27_spill]] %s2587_s21  ;;  %p3238_p1 = scmp.eq.s32.totalorder %s2777_s12, 0 }
  0x1b   : > { %3269 = sst [smem:[#allocation28_spill]] %s2607_s26  ;;  %p325_p2 = scmp.lt.s32.totalorder %s2623_s30, 5 }
  0x1c   : > { %3270 = sst [smem:[#allocation29_spill]] %s2611_s27  ;;  %s2625_s14 = smov [#allocation12]  }
  0x1d   : > { %p2782_p3 = pnand %p1867_p0, %p325_p2  ;;  %s337_s15 = sshll.u32 %s2625_s14, 4  ;;  %s338_s15 = int_to_ptr.vmem [resolvable:$true] %s337_s15 }
  0x1e   : > { %s2626_s11 = smov [#allocation15]   ;;  %s2286_s27 = scalar_lea.vmem %s338_s15, 512 }
  0x1f   : > { %s3271_s13 = scalar_select %p2782_p3, 1, 0 }
  0x20   : > { %p2093_p4 = pneg %p2782_p3  ;;  %s369_s10 = sshll.u32 %s2626_s11, 4  ;;  %s370_s10 = int_to_ptr.vmem [resolvable:$true] %s369_s10 }
  0x21   : > { %3272 = sst [smem:[#allocation30_spill]] %s3271_s13  ;;  %p2287_p7 = scmp.ne.s32.totalorder %s338_s15, %s2286_s27 }
  0x22   : > { %p2790_p5 = pnand %p2093_p4, %p3238_p1  ;;  %p2294_p10 = scmp.lt.s32.totalorder %s338_s15, %s338_s15 }
  0x23   : > { %p2295_p11 = scmp.lt.s32.totalorder %s2286_s27, %s2286_s27 }
  0x24   : > { %p3253_p6 = pneg %p2790_p5 }
  0x25   : > { %p2296_p12 = por %p2295_p11, %p2294_p10 }
  0x26   : > { %p2289_p8 = pnand %p2287_p7, %p3253_p6 }
  0x28   : > { %p2290_p9 = pneg %p2289_p8 }
  0x2a   : > { %p2297_p13 = pnand %p2296_p12, %p2290_p9 }
  0x2c   : > { %2300 = shalt.err (!%p2297_p13)
}
  0x2d   : > { %s3234_s14 = smov 128   ;;  %s3236_s8 = smov 8  }
  0x2e   : > { %s3274_s3 = sld [smem:[#allocation40_spill]]  ;;  %s2312_s4 = scalar_lea.vmem %s370_s10, 512 }
  0x2f   : > { %p2313_p0 = scmp.ne.s32.totalorder %s370_s10, %s2312_s4  ;;  %p2320_p7 = scmp.lt.s32.totalorder %s370_s10, %s370_s10 }
  0x30   : > { %p2321_p8 = scmp.lt.s32.totalorder %s2312_s4, %s2312_s4 }
  0x31   : > { %p2315_p2 = pnand %p2313_p0, %p3253_p6 }
  0x32   : > { %p2322_p9 = por %p2321_p8, %p2320_p7 }
  0x33   : > { %p2316_p4 = pneg %p2315_p2 }
  0x34   : > { %2096 = dma.hbm_to_vmem [thread:$0]  (!%p2790_p5), %s3274_s3, 512, %s338_s15, [#allocation13], %s3234_s14, %s3234_s14, %s3236_s8  }
  0x35   : > { %p2323_p10 = pnand %p2322_p9, %p2316_p4 }
  0x37   : > { %2326 = shalt.err (!%p2323_p10)
}
  0x38   : > { %s3275_s7 = sld [smem:[#allocation43_spill]]  ;;  %s1866_s4 = sadd.s32 4294967294, %s2623_s30  }
  0x39   : > { %s41_s6 = sadd.s32 1, %s2615_s28  ;;  %s44_s26 = sadd.s32 1, %s2619_s29 }
  0x3a   : > { %p42_p11 = scmp.ge.s32.totalorder %s41_s6, 2  ;;  %p3239_p12 = scmp.eq.s32.totalorder %s2623_s30, 0 }
  0x3b   : > { %s79_s15 = sadd.s32 1, %s2591_s22  ;;  %p86_p13 = scmp.ne.s32.totalorder %s2591_s22, %s2587_s21 }
  0x3c   : > { %s3349_s6 = smov (%p42_p11, %s41_s6), 0  ;;  %s3351_s26 = smov (!%p42_p11, %s44_s26), %s2619_s29 }
  0x3d   : > { %3276 = sst [smem:[#allocation31_spill]] %s3349_s6  ;;  %s2828_s11 = ssub.s32 %s2615_s28, %s3349_s6 }
  0x3e   : > { %2102 = dma.hbm_to_vmem [thread:$0]  (!%p2790_p5), %s3275_s7, 512, %s370_s10, [#allocation16], %s3234_s14, %s3234_s14, %s3236_s8  }
  0x3f   : > { %3277 = sst [smem:[#allocation32_spill]] %s2828_s11  ;;  %p46_p0 = scmp.ge.s32.totalorder %s3351_s26, 2 }
  0x40   : > { %p92_p2 = scmp.ne.s32.totalorder %s2587_s21, %s2583_s20  ;;  %p2839_p4 = por %p86_p13, %p3239_p12 }
  0x41   : > { %s3353_s26 = smov (%p46_p0, %s3351_s26), 0  ;;  %p312_p9 = scmp.eq.s32.totalorder %s2777_s12, 3 }
  0x42   : > { %3279 = sst [smem:[#allocation33_spill]] %s3353_s26  ;;  %p2848_p8 = por %p92_p2, %p3238_p1 }
  0x43   : > { %s2855_s14 = ssub.s32 %s2619_s29, %s3353_s26  ;;  %p318_p10 = scmp.eq.s32.totalorder %s1866_s4, 3 }
  0x44   : > { %s3280_s27 = scalar_select %p2848_p8, 1, 0 }
  0x45   : > { %s76_s8 = sor.u32 %s2828_s11, %s2855_s14  ;;  %p2863_p0 = por %p312_p9, %p86_p13 }
  0x46   : > { %3281 = sst [smem:[#allocation34_spill]] %s3280_s27  ;;  %p77_p7 = scmp.eq.s32.totalorder %s76_s8, 0 }
  0x47   : > { %s3282_s3 = scalar_select %p2863_p0, 1, 0 }
  0x48   : > { %p2867_p1 = por %p318_p10, %p92_p2  ;;  %p3252_p12 = scmp.lt.s32.totalorder %s2623_s30, 4 }
  0x49   : > { %3283 = sst [smem:[#allocation35_spill]] %s3282_s3  ;;  %s423_s6 = sand.u32 1, %s2623_s30  }
  0x4a   : > { %s3284_s7 = scalar_select %p2867_p1, 1, 0 }
  0x4b   : > { %s2873_s26 = scalar_select %p77_p7, %s2591_s22, %s79_s15  }
  0x4c   : > { %3285 = sst [smem:[#allocation36_spill]] %s3284_s7  ;;  %s425_s20 = sand.u32 1, %s2591_s22  }
  0x4d   : > { %3286 = sst [smem:[#allocation37_spill]] %s2873_s26  ;;  %s1876_s4 = sshll.u32 %s425_s20, 3 }
  0x4e   : > { %s1877_s27 = sshll.u32 %s2619_s29, 1  ;;  %s427_s2 = scalar_lea.vmem [#allocation9], %s1876_s4 }
  0x4f   : > { %s432_s13 = sadd.s32 %s2615_s28, %s1877_s27  ;;  %s436_s17 = sshll.u32 %s427_s2, 4  ;;  %s437_s17 = int_to_ptr.vmem [resolvable:$true] %s436_s17 }
  0x50   : > { %s1878_s8 = sshll.u32 %s432_s13, 7  ;;  %p2886_p13 = pnand %p3252_p12, %p2839_p4 }
  0x51   : > { %s434_s3 = scalar_lea.hbm %s3222_s1, %s1878_s8  ;;  %s2629_s15 = smov [#allocation14]  }
  0x52   : > { %s353_s26 = sshll.u32 %s2629_s15, 4  ;;  %s2890_s20 = scalar_lea.sflag [#allocation10], %s423_s6  ;;  %s354_s26 = int_to_ptr.vmem [resolvable:$true] %s353_s26 }
  0x53   : > { %p2329_p2 = pneg %p2886_p13  ;;  %s2340_s2 = scalar_lea.vmem %s437_s17, 128 }
  0x54   : > { %p2341_p7 = scmp.ne.s32.totalorder %s437_s17, %s2340_s2  ;;  %s2630_s13 = smov [#allocation9]  }
  0x55   : > { %s2345_s21 = sshll.u32 %s2630_s13, 4  ;;  %s2346_s21 = int_to_ptr.vmem [resolvable:$false] %s2345_s21 }
  0x56   : > { %p2343_p9 = pnand %p2341_p7, %p2329_p2  ;;  %s2347_s11 = scalar_lea.vmem %s2346_s21, 256 }
  0x57   : > { %p2348_p11 = scmp.lt.s32.totalorder %s437_s17, %s2346_s21  ;;  %p2349_p4 = scmp.lt.s32.totalorder %s2347_s11, %s2340_s2 }
  0x58   : > { %p2344_p10 = pneg %p2343_p9 }
  0x59   : > { %p2350_p12 = por %p2349_p4, %p2348_p11 }
  0x5b   : > { %p2351_p6 = pnand %p2350_p12, %p2344_p10 }
  0x5d   : > { %2354 = shalt.err (!%p2351_p6)
}
  0x5e   : > { %2112 = dma.hbm_to_vmem [thread:$0]  (!%p2886_p13), %s434_s3, 128, %s437_s17, %s2890_s20  }
  0x5f   : > { %s2631_s6 = smov [#allocation17]   ;;  %s2366_s27 = scalar_lea.vmem %s354_s26, 512 }
  0x60   : > { %s385_s10 = sshll.u32 %s2631_s6, 4  ;;  %p2367_p2 = scmp.ne.s32.totalorder %s354_s26, %s2366_s27  ;;  %s386_s10 = int_to_ptr.vmem [resolvable:$true] %s385_s10 }
  0x61   : > { %p3288_p7 = pneg %p2790_p5  ;;  %p2374_p0 = scmp.lt.s32.totalorder %s354_s26, %s354_s26 }
  0x62   : > { %p2375_p8 = scmp.lt.s32.totalorder %s2366_s27, %s2366_s27 }
  0x63   : > { %p2369_p9 = pnand %p2367_p2, %p3288_p7 }
  0x64   : > { %p2376_p3 = por %p2375_p8, %p2374_p0 }
  0x65   : > { %p2370_p1 = pneg %p2369_p9 }
  0x67   : > { %p2377_p11 = pnand %p2376_p3, %p2370_p1 }
  0x69   : > { %2380 = shalt.err (!%p2377_p11)
}
  0x6a   : > { %s3289_s7 = smov 8   ;;  %s3290_s4 = smov 128  }
  0x6b   : > { %2099 = dma.hbm_to_vmem [thread:$0]  (!%p2790_p5), %s3226_s5, 512, %s354_s26, [#allocation13], %s3290_s4, %s3290_s4, %s3289_s7  }
  0x6c   : > { %s2392_s8 = scalar_lea.vmem %s386_s10, 512  ;;  %p3291_p12 = pmov %p3288_p7 }
  0x6d   : > { %p2393_p6 = scmp.ne.s32.totalorder %s386_s10, %s2392_s8  ;;  %p2400_p8 = scmp.lt.s32.totalorder %s386_s10, %s386_s10 }
  0x6e   : > { %p2401_p1 = scmp.lt.s32.totalorder %s2392_s8, %s2392_s8 }
  0x6f   : > { %p2395_p13 = pnand %p2393_p6, %p3291_p12 }
  0x70   : > { %p2402_p3 = por %p2401_p1, %p2400_p8 }
  0x71   : > { %p2396_p10 = pneg %p2395_p13 }
  0x73   : > { %p2403_p0 = pnand %p2402_p3, %p2396_p10 }
  0x75   : > { %2406 = shalt.err (!%p2403_p0)
}
  0x76   : > { %2105 = dma.hbm_to_vmem [thread:$0]  (!%p2790_p5), %s3230_s9, 512, %s386_s10, [#allocation16], %s3290_s4, %s3290_s4, %s3289_s7  }
  0x77   : > { %s51_s16 = sadd.s32 1, %s2603_s25  ;;  %p3292_p4 = scmp.eq.s32.totalorder %s2855_s14, 0 }
  0x78   : > { %p58_p2 = scmp.ne.s32.totalorder %s2603_s25, %s2599_s24  ;;  %p64_p7 = scmp.ne.s32.totalorder %s2599_s24, %s2595_s23 }
  0x79   : > { %s2923_s26 = scalar_select %p3292_p4, %s2603_s25, %s51_s16  }
  0x7a   : > { %s402_s13 = sand.u32 1, %s2603_s25   ;;  %s1922_s21 = sshll.u32 %s2619_s29, 8 }
  0x7b   : > { %p3293_p9 = scmp.eq.s32.totalorder %s2623_s30, 0  ;;  %p3294_p6 = scmp.eq.s32.totalorder %s2777_s12, 0 }
  0x7c   : > { %s1873_s6 = sshll.u32 %s402_s13, 4  ;;  %s3296_s0 = sld [smem:[#allocation38_spill]] }
  0x7d   : > { %p60_p11 = por %p3293_p9, %p58_p2  ;;  %p2935_p12 = por %p3294_p6, %p64_p7 }
  0x7e   : > { %s406_s17 = scalar_lea.vmem [#allocation6], %s1873_s6  ;;  %p3297_p5 = scmp.lt.s32.totalorder %s2623_s30, 4 }
  0x7f   : > { %s413_s14 = sshll.u32 %s406_s17, 4  ;;  %s403_s23 = scalar_lea.sflag [#allocation7], %s402_s13  ;;  %s414_s14 = int_to_ptr.vmem [resolvable:$true] %s413_s14 }
  0x80   : > { %p2944_p13 = pnand %p3297_p5, %p60_p11  ;;  %s2420_s15 = scalar_lea.vmem %s414_s14, 256 }
  0x81   : > { %p2421_p8 = scmp.ne.s32.totalorder %s414_s14, %s2420_s15  ;;  %s2632_s2 = smov [#allocation6]  }
  0x82   : > { %s412_s10 = scalar_lea.hbm %s3296_s0, %s1922_s21  ;;  %p2409_p10 = pneg %p2944_p13 }
  0x83   : > { %s2425_s16 = sshll.u32 %s2632_s2, 4  ;;  %s2426_s16 = int_to_ptr.vmem [resolvable:$false] %s2425_s16 }
  0x84   : > { %p2423_p1 = pnand %p2421_p8, %p2409_p10  ;;  %s2427_s21 = scalar_lea.vmem %s2426_s16, 512 }
  0x85   : > { %p2428_p0 = scmp.lt.s32.totalorder %s414_s14, %s2426_s16  ;;  %p2429_p4 = scmp.lt.s32.totalorder %s2427_s21, %s2420_s15 }
  0x86   : > { %p2424_p3 = pneg %p2423_p1 }
  0x87   : > { %p2430_p2 = por %p2429_p4, %p2428_p0 }
  0x89   : > { %p2431_p7 = pnand %p2430_p2, %p2424_p3 }
  0x8b   : > { %2434 = shalt.err (!%p2431_p7)
}
  0x8c   : > { %s3299_s13 = sld [smem:[#allocation32_spill]]  ;;  %s105_s27 = sadd.s32 1, %s2579_s19 }
  0x8d   : > { %s3300_s6 = sld [smem:[#allocation25_spill]]  ;;  %p112_p9 = scmp.ne.s32.totalorder %s2579_s19, %s2575_s18 }
  0x8e   : > { %2109 = dma.hbm_to_vmem [thread:$0]  (!%p2944_p13), %s412_s10, 256, %s414_s14, %s403_s23, %s3290_s4, %s3290_s4, %s3289_s7  }
  0x8f   : > { %p3302_p6 = scmp.eq.s32.totalorder %s2623_s30, 0  ;;  %s445_s17 = sand.u32 1, %s2579_s19  }
  0x90   : > { %s1880_s8 = sshll.u32 %s2615_s28, 7  ;;  %p3303_p8 = scmp.eq.s32.totalorder %s2777_s12, 0 }
  0x91   : > { %p114_p5 = por %p112_p9, %p3302_p6  ;;  %s1879_s2 = sshll.u32 %s445_s17, 3 }
  0x92   : > { %p3301_p11 = scmp.eq.s32.totalorder %s3299_s13, 0  ;;  %s3305_s0 = sld [smem:[#allocation39_spill]] }
  0x93   : > { %p118_p10 = scmp.ne.s32.totalorder %s2575_s18, %s3300_s6  ;;  %s447_s4 = scalar_lea.vmem [#allocation11], %s1879_s2 }
  0x94   : > { %s2961_s3 = scalar_select %p3301_p11, %s2579_s19, %s105_s27  }
  0x95   : > { %p2971_p1 = por %p118_p10, %p3303_p8  ;;  %s454_s10 = sshll.u32 %s447_s4, 4  ;;  %s455_s10 = int_to_ptr.vmem [resolvable:$true] %s454_s10 }
  0x96   : > { %p3306_p13 = scmp.lt.s32.totalorder %s2623_s30, 4  ;;  %s2448_s23 = scalar_lea.vmem %s455_s10, 128 }
  0x97   : > { %p2449_p4 = scmp.ne.s32.totalorder %s455_s10, %s2448_s23  ;;  %s2633_s13 = smov [#allocation11]  }
  0x98   : > { %s452_s7 = scalar_lea.hbm %s3305_s0, %s1880_s8  ;;  %p2980_p3 = pnand %p3306_p13, %p114_p5 }
  0x99   : > { %s2453_s6 = sshll.u32 %s2633_s13, 4  ;;  %s2454_s6 = int_to_ptr.vmem [resolvable:$false] %s2453_s6 }
  0x9a   : > { %p2437_p0 = pneg %p2980_p3  ;;  %s2455_s27 = scalar_lea.vmem %s2454_s6, 256 }
  0x9b   : > { %p2456_p9 = scmp.lt.s32.totalorder %s455_s10, %s2454_s6  ;;  %p2457_p11 = scmp.lt.s32.totalorder %s2455_s27, %s2448_s23 }
  0x9c   : > { %p2451_p2 = pnand %p2449_p4, %p2437_p0 }
  0x9d   : > { %p2458_p6 = por %p2457_p11, %p2456_p9 }
  0x9e   : > { %p2452_p7 = pneg %p2451_p2 }
  0xa0   : > { %p2459_p10 = pnand %p2458_p6, %p2452_p7 }
  0xa2   : > { %2462 = shalt.err (!%p2459_p10)
}
  0xa3   : > { %2115 = dma.hbm_to_vmem [thread:$0]  (!%p2980_p3), %s452_s7, 128, %s455_s10, %s2890_s20  }
  0xa4   : > { %s3308_s0 = sld [smem:[#allocation30_spill]] }
  0xaa   : > { %p3309_p5 = scmp.ne.s32.totalorder %s3308_s0, 0 }
  0xab   : > { %s465_s17 = sand.u32 (!%p3309_p5), 1, %s2599_s24  }
  0xac   : > { %463 = sbr.rel (%p3309_p5) target bundleno = 1919 (0x77f), region = 64  ;;  %s2992_s8 = sshll.u32 (!%p3309_p5), %s465_s17, 4 }
  0xad   : > { %s466_s2 = scalar_lea.sflag (!%p3309_p5), [#allocation7], %s465_s17  ;;  %s469_s16 = scalar_lea.vmem (!%p3309_p5), [#allocation6], %s2992_s8 }
  0xb1   : > { %2546 = dma.done.wait (%p2935_p12), %s466_s2, 256  }
  0xb2   : > { %2548 = vsyncadd (%p2935_p12), %s466_s2, 4294967040  ;;  %s3310_s21 = sld [smem:[#allocation27_spill]]  ;;  %s474_s7 = sand.u32 1, %s2777_s12  }
  0xb3   : > { %s3311_s20 = sld [smem:[#allocation34_spill]]  ;;  %s475_s14 = scalar_lea.sflag [#allocation10], %s474_s7 }
  0xb8   : > { %s476_s4 = sand.u32 1, %s3310_s21  }
  0xb9   : > { %s3003_s10 = sshll.u32 %s476_s4, 3  ;;  %p3312_p8 = scmp.ne.s32.totalorder %s3311_s20, 0 }
  0xba   : > { %s478_s23 = scalar_lea.vmem [#allocation9], %s3003_s10 }
  0xbb   : > { %2550 = dma.done.wait (%p3312_p8), %s475_s14, 128  }
  0xbc   : > { %2552 = vsyncadd (%p3312_p8), %s475_s14, 4294967168  ;;  %s485_s11 = sand.u32 1, %s2575_s18  }
  0xbd   : > { %s3011_s13 = sshll.u32 %s485_s11, 3 }
  0xbe   : > { %s487_s6 = scalar_lea.vmem [#allocation11], %s3011_s13 }
  0xbf   : > { %2554 = dma.done.wait (%p2971_p1), %s475_s14, 128  }
  0xc0   : > { %2556 = vsyncadd (%p2971_p1), %s475_s14, 4294967168  ;;  %p3313_p12 = scmp.eq.s32.totalorder %s2777_s12, 0 }
  0xc2   : > { %2558 = dma.done.wait (%p3313_p12), [#allocation13], 1024   ;;  %p3314_p13 = pmov %p3313_p12 }
  0xc3   : > { %p3315_p3 = pmov %p3313_p12 }
  0xc4   : > { %2560 = vsyncadd (%p3314_p13), [#allocation13], 4294966272 }
  0xc5   : > { %2562 = dma.done.wait (%p3315_p3), [#allocation16], 1024   ;;  %p3316_p0 = pmov %p3315_p3 }
  0xc6   : > { %s551_s27 = scalar_lea.vmem [#allocation18], %s3003_s10  ;;  %s3317_s0 = sld [smem:[#allocation28_spill]] }
  0xc7   : > { %2564 = vsyncadd (%p3316_p0), [#allocation16], 4294966272 }
  0xcc   : > { %p1890_p4 = scmp.ne.s32.totalorder %s3317_s0, 0 }
  0xcd   : > { %s3318_s17 = sld [smem:[#allocation41_spill]] (!%p1890_p4)  ;;  %s2634_s8 = smov (!%p1890_p4), 120  }
  0xce   : > { %555 = sbr.rel (%p1890_p4) target bundleno = 553 (0x229), region = 96  ;;  %s3319_s20 = sld [smem:[#allocation42_spill]] (!%p1890_p4) }
  0xcf   : > { %s2636_s7 = smov (!%p1890_p4), 104  }
  0xd3   : > { %v561_v0 = vld [vmem:[#allocation12 + $0x18] sm:$0xff]  ;;  %v560_v2 = vld [vmem:[#allocation12 + $0x10] sm:$0xff]  ;;  %v559_v4 = vld [vmem:[#allocation12 + $0x8] sm:$0xff]  ;;  %vm569_vm0 = vcmask 261120   ;;  %vm737_vm1 = vcmask 64512  }
  0xd4   : > { %v654_v1 = vld [vmem:[#allocation14 + $0x18] sm:$0xff]  ;;  %1969 = vmatprep.subr.mxu0 %v561_v0  ;;  %v653_v3 = vld [vmem:[#allocation14 + $0x10] sm:$0xff]  ;;  %v652_v5 = vld [vmem:[#allocation14 + $0x8] sm:$0xff] }
  0xd5   : > { %1980 = vmatprep.subr.mxu1 %v654_v1  ;;  %1970 = vmatpush3.msra.mxu0 %v561_v0  ;;  %v558_v6 = vld [vmem:[#allocation12] sm:$0xff]  ;;  %v557_v9 = vld [vmem:[%s469_s16 + $0x8] sm:$0xff] }
  0xd6   : > { %1981 = vmatpush3.msra.mxu1 %v654_v1  ;;  %1971 = vmatprep.subr.mxu0 %v560_v2  ;;  %v651_v7 = vld [vmem:[#allocation14] sm:$0xff]  ;;  %v1891_v10 = vld [vmem:[%s3318_s17] ss:$0 sm:$0xff] }
  0xd7   : > { %1982 = vmatprep.subr.mxu1 %v653_v3  ;;  %1972 = vmatpush3.msra.mxu0 %v560_v2  ;;  %v556_v8 = vld [vmem:[%s469_s16] sm:$0xff]  ;;  %v1894_v11 = vld [vmem:[%s3319_s20] ss:$0 sm:$0xff]  ;;  %s2635_s16 = smov 112  }
  0xd8   : > { %1983 = vmatpush3.msra.mxu1 %v653_v3  ;;  %1973 = vmatprep.subr.mxu0 %v559_v4 }
  0xd9   : > { %1984 = vmatprep.subr.mxu1 %v652_v5  ;;  %1974 = vmatpush3.msra.mxu0 %v559_v4 }
  0xda   : > { %1985 = vmatpush3.msra.mxu1 %v652_v5  ;;  %1975 = vmatprep.subr.mxu0 %v558_v6 }
  0xdb   : > { %1986 = vmatprep.subr.mxu1 %v651_v7  ;;  %1976 = vmatpush3.msra.mxu0 %v558_v6 }
  0xdc   : > { %1977 = vmatprep.mubr.msk.f32.mxu0 %vm569_vm0, %v556_v8  ;;  %1987 = vmatpush3.msra.mxu1 %v651_v7 }
  0xdd   : > { %1988 = vmatprep.mubr.msk.f32.mxu1 %vm569_vm0, %v556_v8  ;;  %1978 = vmatmul.mubr.msk.f32.vlgmr.msra.gmra.mxu0 %vm569_vm0, %v557_v9 }
  0xde   : > { %1989 = vmatmul.mubr.msk.f32.vlgmr.msra.gmra.mxu1 %vm569_vm0, %v557_v9 }
 0x19d   : > { %v1979_v12 = vpop.f32.mrf.mxu0 }
 0x19e   : > { %v1990_v13 = vpop.f32.mrf.mxu1  ;;  %v648_v14 = vadd.f32 %v1979_v12, %v1891_v10 }
 0x19f   : > { %v734_v15 = vadd.f32 %v1990_v13, %v1894_v11  ;;  %v642_v16 = vpop.f32.mrf.mxu0 }
 0x1a0   : > { %v728_v17 = vpop.f32.mrf.mxu1  ;;  %739 = vst.msk [vmem:[#allocation2 + $0x8] sm:$0xff] %vm737_vm1, %v648_v14  ;;  %v643_v18 = vadd.f32 %v1891_v10, %v642_v16  ;;  %746 = vrot.lane.b32.xlu0 %v648_v14, %s2634_s8 }
 0x1a1   : > { %741 = vst.msk [vmem:[#allocation3 + $0x8] sm:$0xff] %vm737_vm1, %v734_v15  ;;  %v729_v19 = vadd.f32 %v1894_v11, %v728_v17  ;;  %757 = vrot.lane.b32.xlu1 %v734_v15, %s2634_s8 }
 0x1a2   : > { %738 = vst.msk [vmem:[#allocation2] sm:$0xff] %vm737_vm1, %v643_v18 }
 0x1a3   : > { %740 = vst.msk [vmem:[#allocation3] sm:$0xff] %vm737_vm1, %v729_v19 }
 0x1a4   : > { %744 = vrot.lane.b32.xlu0 %v643_v18, %s2634_s8 }
 0x1a5   : > { %766 = vrot.lane.b32.xlu1 %v648_v14, %s2635_s16 }
 0x1a8   : > { %764 = vrot.lane.b32.xlu0 %v643_v18, %s2635_s16 }
 0x1a9   : > { %775 = vrot.lane.b32.xlu1 %v734_v15, %s2635_s16 }
 0x1ac   : > { %773 = vrot.lane.b32.xlu0 %v729_v19, %s2635_s16 }
 0x1ad   : > { %784 = vrot.lane.b32.xlu1 %v648_v14, %s2636_s7 }
 0x1b0   : > { %782 = vrot.lane.b32.xlu0 %v643_v18, %s2636_s7 }
 0x1b1   : > { %755 = vrot.lane.b32.xlu1 %v729_v19, %s2634_s8 }
 0x1b4   : > { %791 = vrot.lane.b32.xlu0 %v729_v19, %s2636_s7 }
 0x1b5   : > { %793 = vrot.lane.b32.xlu1 %v734_v15, %s2636_s7 }
 0x212   : > { %v747_v21 = vpop.permute.xlu0 %746 }
 0x213   : > { %v758_v20 = vpop.permute.xlu1 %757  ;;  %752 = vst.msk [vmem:[#allocation2 + $0x18] sm:$0xff] %vm737_vm1, %v747_v21 }
 0x214   : > { %763 = vst.msk [vmem:[#allocation3 + $0x18] sm:$0xff] %vm737_vm1, %v758_v20 }
 0x216   : > { %v745_v23 = vpop.permute.xlu0 %744 }
 0x217   : > { %v767_v22 = vpop.permute.xlu1 %766  ;;  %751 = vst.msk [vmem:[#allocation2 + $0x10] sm:$0xff] %vm737_vm1, %v745_v23 }
 0x218   : > { %772 = vst.msk [vmem:[#allocation2 + $0x28] sm:$0xff] %vm737_vm1, %v767_v22 }
 0x21a   : > { %v765_v25 = vpop.permute.xlu0 %764 }
 0x21b   : > { %v776_v24 = vpop.permute.xlu1 %775  ;;  %771 = vst.msk [vmem:[#allocation2 + $0x20] sm:$0xff] %vm737_vm1, %v765_v25 }
 0x21c   : > { %781 = vst.msk [vmem:[#allocation3 + $0x28] sm:$0xff] %vm737_vm1, %v776_v24 }
 0x21e   : > { %v774_v27 = vpop.permute.xlu0 %773 }
 0x21f   : > { %v785_v26 = vpop.permute.xlu1 %784  ;;  %780 = vst.msk [vmem:[#allocation3 + $0x20] sm:$0xff] %vm737_vm1, %v774_v27 }
 0x220   : > { %790 = vst.msk [vmem:[#allocation2 + $0x38] sm:$0xff] %vm737_vm1, %v785_v26 }
 0x222   : > { %v783_v29 = vpop.permute.xlu0 %782 }
 0x223   : > { %v756_v28 = vpop.permute.xlu1 %755  ;;  %789 = vst.msk [vmem:[#allocation2 + $0x30] sm:$0xff] %vm737_vm1, %v783_v29 }
 0x224   : > { %762 = vst.msk [vmem:[#allocation3 + $0x10] sm:$0xff] %vm737_vm1, %v756_v28 }
 0x226   : > { %v792_v31 = vpop.permute.xlu0 %791 }
 0x227   : > { %v794_v30 = vpop.permute.xlu1 %793  ;;  %798 = vst.msk [vmem:[#allocation3 + $0x30] sm:$0xff] %vm737_vm1, %v792_v31 }
 0x228   : > { %799 = vst.msk [vmem:[#allocation3 + $0x38] sm:$0xff] %vm737_vm1, %v794_v30 }
 0x229 PF: > { %v804_v32 = vld [vmem:[#allocation15 + $0x18] sm:$0xff]  ;;  %v2637_v33 = vmov 0.0   ;;  %v803_v34 = vld [vmem:[#allocation15 + $0x10] sm:$0xff]  ;;  %vm2638_vm2 = vmmov 0   ;;  %v802_v35 = vld [vmem:[#allocation15 + $0x8] sm:$0xff]  ;;  %vm812_vm3 = vcmask 261120  }
 0x22a   : > { %1991 = vmatprep.subr.mxu0 %v2637_v33  ;;  %1999 = vmatprep.mubr.msk.f32.mxu0 %vm2638_vm2, %v2637_v33  ;;  %v801_v36 = vld [vmem:[#allocation15] sm:$0xff]  ;;  %vm886_vm4 = vcmask 64512   ;;  %v908_v39 = vld [vmem:[#allocation2] sm:$0xff]  ;;  %v911_v40 = vld [vmem:[#allocation2 + $0x18] sm:$0xff]  ;;  %s3320_s11 = sld [smem:[#allocation44_spill]]  ;;  %s2639_s0 = smov 104  }
 0x22b   : > { %1992 = vmatpush3.msra.mxu0 %v804_v32  ;;  %2002 = vmatprep.subr.mxu1 %v2637_v33  ;;  %v800_v37 = vld [vmem:[%s478_s23] sm:$0xff]  ;;  %s2640_s12 = smov 120   ;;  %s2641_s15 = smov 112   ;;  %v912_v48 = vld [vmem:[#allocation2 + $0x20] sm:$0xff]  ;;  %v915_v52 = vld [vmem:[#allocation2 + $0x38] sm:$0xff]  ;;  %vm1241_vm5 = vcmask 130048  }
 0x22c   : > { %1993 = vmatprep.subr.mxu0 %v2637_v33  ;;  %2006 = vmatprep.mubr.msk.f32.mxu1 %vm2638_vm2, %v2637_v33  ;;  %v909_v38 = vld [vmem:[#allocation2 + $0x8] sm:$0xff]  ;;  %v910_v41 = vld [vmem:[#allocation2 + $0x10] sm:$0xff]  ;;  %v924_v57 = vld [vmem:[%s487_s6] sm:$0xff]  ;;  %s2642_s13 = smov 8   ;;  %s2643_s6 = smov 16   ;;  %vm1583_vm6 = vcmask 130112  }
 0x22d   : > { %1994 = vmatpush3.msra.mxu0 %v803_v34  ;;  %2003 = vmatpush3.xpose.msk.msra.mxu1 %vm886_vm4, %v909_v38  ;;  %v913_v46 = vld [vmem:[#allocation2 + $0x28] sm:$0xff]  ;;  %v914_v54 = vld [vmem:[#allocation2 + $0x30] sm:$0xff]  ;;  %v916_v16 = vld [vmem:[#allocation3] sm:$0xff]  ;;  %s3321_s17 = sld [smem:[#allocation29_spill]]  ;;  %s2644_s21 = smov 24   ;;  %vm1589_vm7 = vcmask 195712  }
 0x22e   : > { %1995 = vmatprep.subr.mxu0 %v2637_v33  ;;  %2004 = vmatprep.subr.mxu1 %v2637_v33  ;;  %v917_v15 = vld [vmem:[#allocation3 + $0x8] sm:$0xff]  ;;  %s3322_s2 = sld [smem:[#allocation28_spill]]  ;;  %vm1595_vm8 = vcmask 261312  }
 0x22f   : > { %1996 = vmatpush3.msra.mxu0 %v802_v35  ;;  %s3324_s8 = sld [smem:[#allocation35_spill]] }
 0x230   : > { %1997 = vmatprep.subr.mxu0 %v2637_v33  ;;  %v1897_v42 = vld [vmem:[%s3320_s11] ss:$0 sm:$0xff]  ;;  %s3325_s11 = sld [smem:[#allocation45_spill]] }
 0x231   : > { %1998 = vmatpush3.msra.mxu0 %v801_v36  ;;  %2005 = vmatpush3.xpose.msk.msra.mxu1 %vm886_vm4, %v908_v39  ;;  %v919_v36 = vld [vmem:[#allocation3 + $0x18] sm:$0xff] }
 0x232   : > { %2000 = vmatmul.mubr.msk.f32.vlgmr.msra.gmra.mxu0 %vm812_vm3, %v800_v37  ;;  %2009 = vmatprep.subr.mxu0 %v2637_v33  ;;  %v918_v37 = vld [vmem:[#allocation3 + $0x10] sm:$0xff] }
 0x233   : > { %2013 = vmatprep.mubr.msk.f32.mxu0 %vm2638_vm2, %v2637_v33  ;;  %2016 = vmatprep.subr.mxu1 %v2637_v33  ;;  %s1918_s16 = sshll.u32 %s3321_s17, 1  ;;  %s1684_s17 = scalar_lea.sflag [#allocation8], %s476_s4 }
 0x234   : > { %2010 = vmatpush3.xpose.msk.msra.mxu0 %vm886_vm4, %v911_v40  ;;  %s1695_s7 = sadd.s32 %s3322_s2, %s1918_s16  ;;  %s2645_s16 = smov [#allocation18]  }
 0x235   : > { %2011 = vmatprep.subr.mxu0 %v2637_v33  ;;  %p3327_p2 = scmp.ne.s32.totalorder %s3324_s8, 0 }
 0x238   : > { %2012 = vmatpush3.xpose.msk.msra.mxu0 %vm886_vm4, %v910_v41 }
 0x239   : > { %2023 = vmatprep.subr.mxu0 %v2637_v33 }
 0x2f2   : > { %v882_v43 = vpop.f32.mrf.mxu0 }
 0x2f3   : > { %v883_v44 = vadd.f32 %v1897_v42, %v882_v43  ;;  %v921_v43 = vld [vmem:[#allocation3 + $0x28] sm:$0xff] }
 0x2f4   : > { %v2001_v45 = vpop.f32.mrf.mxu0 }
 0x2f5   : > { %887 = vst.msk [vmem:[#allocation4] sm:$0xff] %vm886_vm4, %v883_v44  ;;  %899 = vrot.lane.b32.xlu1 %v883_v44, %s2639_s0  ;;  %889 = vrot.lane.b32.xlu0 %v883_v44, %s2640_s12  ;;  %s1919_s0 = sshll.u32 %s1695_s7, 7  ;;  %s1699_s12 = sshll.u32 %s551_s27, 4  ;;  %s1700_s12 = int_to_ptr.vmem [resolvable:$true] %s1699_s12 }
 0x2f6   : > { %s2463_s2 = scalar_lea.vmem %s1700_s12, 128  ;;  %s2467_s7 = sshll.u32 %s2645_s16, 4  ;;  %s2468_s7 = int_to_ptr.vmem [resolvable:$false] %s2467_s7 }
 0x2f7   : > { %p2464_p1 = scmp.ne.s32.totalorder %s1700_s12, %s2463_s2  ;;  %s2469_s14 = scalar_lea.vmem %s2468_s7, 256 }
 0x2f8   : > { %p2470_p11 = scmp.lt.s32.totalorder %s1700_s12, %s2468_s7  ;;  %p2471_p6 = scmp.lt.s32.totalorder %s2469_s14, %s2463_s2 }
 0x2f9   : > { %894 = vrot.lane.b32.xlu0 %v883_v44, %s2641_s15  ;;  %v920_v44 = vld [vmem:[#allocation3 + $0x20] sm:$0xff]  ;;  %p2465_p7 = pnand %p2464_p1, %p3327_p2 }
 0x2fa   : > { %p2472_p10 = por %p2471_p6, %p2470_p11 }
 0x2fb   : > { %p2466_p9 = pneg %p2465_p7 }
 0x2fc   : > { %v904_v47 = vld [vmem:[#allocation4] sm:$0xff] }
 0x2fd   : > { %2007 = vmatmul.mubr.msk.f32.vlgmr.msra.gmra.mxu1 %vm886_vm4, %v904_v47  ;;  %v923_v47 = vld [vmem:[#allocation3 + $0x38] sm:$0xff]  ;;  %p2473_p5 = pnand %p2472_p10, %p2466_p9 }
 0x2fe   : > { %2017 = vmatpush3.xpose.msk.msra.mxu1 %vm886_vm4, %v913_v46  ;;  %2020 = vmatprep.mubr.msk.f32.mxu1 %vm2638_vm2, %v2637_v33 }
 0x2ff   : > { %2018 = vmatprep.subr.mxu1 %v2637_v33 }
 0x302   : > { %2019 = vmatpush3.xpose.msk.msra.mxu1 %vm886_vm4, %v912_v48  ;;  %v922_v48 = vld [vmem:[#allocation3 + $0x30] sm:$0xff] }
 0x303   : > { %2030 = vmatprep.subr.mxu1 %v2637_v33 }
 0x367   : > { %v900_v49 = vpop.permute.xlu1 %899  ;;  %v890_v50 = vpop.permute.xlu0 %889 }
 0x368   : > { %903 = vst.msk [vmem:[#allocation4 + $0x18] sm:$0xff] %vm886_vm4, %v900_v49  ;;  %893 = vst.msk [vmem:[#allocation4 + $0x8] sm:$0xff] %vm886_vm4, %v890_v50 }
 0x36b   : > { %v895_v51 = vpop.permute.xlu0 %894 }
 0x36c   : > { %898 = vst.msk [vmem:[#allocation4 + $0x10] sm:$0xff] %vm886_vm4, %v895_v51 }
 0x36f   : > { %v905_v53 = vld [vmem:[#allocation4 + $0x8] sm:$0xff]  ;;  %v907_v56 = vld [vmem:[#allocation4 + $0x18] sm:$0xff] }
 0x370   : > { %2014 = vmatmul.mubr.msk.f32.vlgmr.msra.gmra.mxu0 %vm886_vm4, %v905_v53  ;;  %v1601_v53 = vld [vmem:[#allocation17 + $0x18] sm:$0xff] }
 0x371   : > { %2024 = vmatpush3.xpose.msk.msra.mxu0 %vm886_vm4, %v915_v52  ;;  %2027 = vmatprep.mubr.msk.f32.mxu0 %vm2638_vm2, %v2637_v33 }
 0x372   : > { %2025 = vmatprep.subr.mxu0 %v2637_v33 }
 0x373   : > { %v906_v55 = vld [vmem:[#allocation4 + $0x10] sm:$0xff] }
 0x374   : > { %2021 = vmatmul.mubr.msk.f32.vlgmr.msra.gmra.mxu1 %vm886_vm4, %v906_v55  ;;  %v1599_v55 = vld [vmem:[#allocation17 + $0x8] sm:$0xff] }
 0x375   : > { %2026 = vmatpush3.xpose.msk.msra.mxu0 %vm886_vm4, %v914_v54  ;;  %2034 = vmatprep.mubr.msk.f32.mxu1 %vm2638_vm2, %v2637_v33  ;;  %v1600_v54 = vld [vmem:[#allocation17 + $0x10] sm:$0xff] }
 0x376   : > { %2058 = vmatprep.subr.mxu0 %v2637_v33  ;;  %2031 = vmatpush3.msra.mxu1 %v917_v15 }
 0x377   : > { %2032 = vmatprep.subr.mxu1 %v2637_v33 }
 0x378   : > { %2028 = vmatmul.mubr.msk.f32.vlgmr.msra.gmra.mxu0 %vm886_vm4, %v907_v56  ;;  %2033 = vmatpush3.msra.mxu1 %v916_v16 }
 0x379   : > { %2066 = vmatprep.mubr.msk.f32.mxu0 %vm2638_vm2, %v2637_v33  ;;  %2037 = vmatprep.subr.mxu1 %v2637_v33 }
 0x37a   : > { %2059 = vmatpush3.msra.mxu0 %v1601_v53 }
 0x37b   : > { %2060 = vmatprep.subr.mxu0 %v2637_v33 }
 0x37c   : > { %2061 = vmatpush3.msra.mxu0 %v1600_v54 }
 0x37d   : > { %2062 = vmatprep.subr.mxu0 %v2637_v33 }
 0x37e   : > { %2063 = vmatpush3.msra.mxu0 %v1599_v55 }
 0x37f   : > { %2064 = vmatprep.subr.mxu0 %v2637_v33 }
 0x3bd   : > { %v1000_v58 = vpop.f32.mrf.mxu1 }
 0x3be   : > { %v1001_v59 = vadd.f32 %v1000_v58, %v924_v57 }
 0x3bf   : > { %v2008_v60 = vpop.f32.mrf.mxu1 }
 0x3c0   : > { %v1242_v61 = vsel %vm1241_vm5, %v1001_v59, -inf }
 0x3c1   : > { %1243 = vmax.xlane.f32.xlu1 %v1242_v61 }
 0x430   : > { %v1079_v62 = vpop.f32.mrf.mxu0 }
 0x431   : > { %v1080_v63 = vadd.f32 %v1079_v62, %v924_v57 }
 0x432   : > { %v2015_v0 = vpop.f32.mrf.mxu0 }
 0x433   : > { %v1245_v1 = vsel %vm1241_vm5, %v1080_v63, -inf }
 0x434   : > { %v1158_v2 = vpop.f32.mrf.mxu1  ;;  %1246 = vmax.xlane.f32.xlu0 %v1245_v1 }
 0x435   : > { %v1159_v3 = vadd.f32 %v1158_v2, %v924_v57  ;;  %v1915_v2 = vld [vmem:[%s3325_s11] ss:$0 sm:$0xff] }
 0x436   : > { %v2022_v4 = vpop.f32.mrf.mxu1 }
 0x437   : > { %v1248_v5 = vsel %vm1241_vm5, %v1159_v3, -inf }
 0x438   : > { %v1237_v6 = vpop.f32.mrf.mxu0  ;;  %1249 = vmax.xlane.f32.xlu0 %v1248_v5 }
 0x439   : > { %v1238_v7 = vadd.f32 %v1237_v6, %v924_v57  ;;  %v1598_v57 = vld [vmem:[#allocation17] sm:$0xff] }
 0x43a   : > { %v2029_v8 = vpop.f32.mrf.mxu0  ;;  %2065 = vmatpush3.msra.mxu0 %v1598_v57 }
 0x43b   : > { %v1251_v9 = vsel %vm1241_vm5, %v1238_v7, -inf }
 0x43c   : > { %1252 = vmax.xlane.f32.xlu1 %v1251_v9 }
 0x44a   : > { %v1244_v10 = vpop.xlane.xlu1 %1243 }
 0x44b   : > { %v1254_v11 = vsub.f32 %v1001_v59, %v1244_v10 }
 0x44d   : > { %v1258_v12 = vmul.f32 1.442695, %v1254_v11 }
 0x44f   : > { %2259 = vpow2.f32 %v1258_v12 }
 0x45c   : > { %v2260_v13 = vpop.eup %2259 }
 0x45d   : > { %v1266_v14 = vsel %vm1241_vm5, %v2260_v13, 0.0 }
 0x45e   : > { %1267 = vadd.xlane.f32.xlu0 %v1266_v14 }
 0x4bd   : > { %v1247_v17 = vpop.xlane.xlu0 %1246 }
 0x4be   : > { %v1255_v18 = vsub.f32 %v1080_v63, %v1247_v17 }
 0x4c0   : > { %v1260_v19 = vmul.f32 1.442695, %v1255_v18 }
 0x4c1   : > { %v1250_v20 = vpop.xlane.xlu0 %1249 }
 0x4c2   : > { %2261 = vpow2.f32 %v1260_v19  ;;  %v1256_v21 = vsub.f32 %v1159_v3, %v1250_v20 }
 0x4c4   : > { %v1262_v22 = vmul.f32 1.442695, %v1256_v21 }
 0x4c5   : > { %v1253_v23 = vpop.xlane.xlu1 %1252 }
 0x4c6   : > { %2263 = vpow2.f32 %v1262_v22  ;;  %v1257_v24 = vsub.f32 %v1238_v7, %v1253_v23 }
 0x4c8   : > { %v1264_v25 = vmul.f32 1.442695, %v1257_v24 }
 0x4ca   : > { %2265 = vpow2.f32 %v1264_v25 }
 0x4cf   : > { %v2262_v26 = vpop.eup %2261 }
 0x4d0   : > { %v1269_v27 = vsel %vm1241_vm5, %v2262_v26, 0.0 }
 0x4d1   : > { %1270 = vadd.xlane.f32.xlu1 %v1269_v27 }
 0x4d3   : > { %v2264_v28 = vpop.eup %2263 }
 0x4d4   : > { %v1272_v29 = vsel %vm1241_vm5, %v2264_v28, 0.0 }
 0x4d5   : > { %1273 = vadd.xlane.f32.xlu0 %v1272_v29 }
 0x4d7   : > { %v2266_v30 = vpop.eup %2265 }
 0x4d8   : > { %v1275_v31 = vsel %vm1241_vm5, %v2266_v30, 0.0 }
 0x4d9   : > { %1276 = vadd.xlane.f32.xlu1 %v1275_v31 }
 0x4e7   : > { %v1268_v32 = vpop.xlane.xlu0 %1267 }
 0x4e8   : > { %2267 = vrcp.f32 %v1268_v32 }
 0x4f5   : > { %v2268_v34 = vpop.eup %2267 }
 0x4f6   : > { %v1282_v35 = vmul.f32 %v2268_v34, %v2260_v13 }
 0x4f8   : > { %2035 = vmatmul.mubr.msk.f32.vlgmr.msra.gmra.mxu1 %vm1241_vm5, %v1282_v35 }
 0x4f9   : > { %2038 = vmatpush3.msra.mxu1 %v919_v36  ;;  %2041 = vmatprep.mubr.msk.f32.mxu1 %vm2638_vm2, %v2637_v33 }
 0x4fa   : > { %2039 = vmatprep.subr.mxu1 %v2637_v33 }
 0x4fb   : > { %2040 = vmatpush3.msra.mxu1 %v918_v37 }
 0x4fc   : > { %2044 = vmatprep.subr.mxu1 %v2637_v33 }
 0x55a   : > { %v1271_v38 = vpop.xlane.xlu1 %1270 }
 0x55b   : > { %2269 = vrcp.f32 %v1271_v38 }
 0x55e   : > { %v1274_v39 = vpop.xlane.xlu0 %1273 }
 0x55f   : > { %2271 = vrcp.f32 %v1274_v39 }
 0x562   : > { %v1277_v40 = vpop.xlane.xlu1 %1276 }
 0x563   : > { %2273 = vrcp.f32 %v1277_v40 }
 0x568   : > { %v2270_v41 = vpop.eup %2269 }
 0x569   : > { %v1283_v42 = vmul.f32 %v2270_v41, %v2262_v26 }
 0x56b   : > { %2042 = vmatmul.mubr.msk.f32.vlgmr.msra.gmra.mxu1 %vm1241_vm5, %v1283_v42 }
 0x56c   : > { %v2272_v45 = vpop.eup %2271  ;;  %2045 = vmatpush3.msra.mxu1 %v921_v43  ;;  %2048 = vmatprep.mubr.msk.f32.mxu1 %vm2638_vm2, %v2637_v33 }
 0x56d   : > { %2046 = vmatprep.subr.mxu1 %v2637_v33  ;;  %v1284_v46 = vmul.f32 %v2272_v45, %v2264_v28 }
 0x56e   : > { %2047 = vmatpush3.msra.mxu1 %v920_v44 }
 0x56f   : > { %2051 = vmatprep.subr.mxu1 %v2637_v33  ;;  %2049 = vmatmul.mubr.msk.f32.vlgmr.msra.gmra.mxu1 %vm1241_vm5, %v1284_v46 }
 0x570   : > { %v2274_v49 = vpop.eup %2273  ;;  %2052 = vmatpush3.msra.mxu1 %v923_v47  ;;  %2055 = vmatprep.mubr.msk.f32.mxu1 %vm2638_vm2, %v2637_v33 }
 0x571   : > { %2053 = vmatprep.subr.mxu1 %v2637_v33  ;;  %v1285_v50 = vmul.f32 %v2274_v49, %v2266_v30 }
 0x572   : > { %2054 = vmatpush3.msra.mxu1 %v922_v48 }
 0x573   : > { %2056 = vmatmul.mubr.msk.f32.vlgmr.msra.gmra.mxu1 %vm1241_vm5, %v1285_v50 }
 0x5b8   : > { %v1355_v51 = vpop.f32.mrf.mxu1 }
 0x5b9   : > { %1578 = vst.msk [vmem:[#allocation5] sm:$0xff] %vm886_vm4, %v1355_v51 }
 0x5ba   : > { %v2036_v52 = vpop.f32.mrf.mxu1 }
 0x62b   : > { %v1428_v56 = vpop.f32.mrf.mxu1 }
 0x62c   : > { %1580 = vrot.lane.b32.xlu0 %v1428_v56, %s2642_s13 }
 0x62d   : > { %v2043_v58 = vpop.f32.mrf.mxu1 }
 0x62f   : > { %v1501_v59 = vpop.f32.mrf.mxu1 }
 0x630   : > { %1586 = vrot.lane.b32.xlu1 %v1501_v59, %s2643_s6  ;;  %s3326_s6 = sld [smem:[#allocation46_spill]] }
 0x631   : > { %v2050_v60 = vpop.f32.mrf.mxu1 }
 0x633   : > { %v1574_v61 = vpop.f32.mrf.mxu1 }
 0x634   : > { %1592 = vrot.lane.b32.xlu1 %v1574_v61, %s2644_s21 }
 0x635   : > { %v2057_v62 = vpop.f32.mrf.mxu1 }
 0x636   : > { %s3146_s21 = scalar_lea.hbm %s3326_s6, %s1919_s0 }
 0x69e   : > { %v1581_v63 = vpop.permute.xlu0 %1580 }
 0x69f   : > { %1584 = vst.msk [vmem:[#allocation5] sm:$0xff] %vm1583_vm6, %v1581_v63 }
 0x6a2   : > { %v1587_v0 = vpop.permute.xlu1 %1586 }
 0x6a3   : > { %1590 = vst.msk [vmem:[#allocation5] sm:$0xff] %vm1589_vm7, %v1587_v0 }
 0x6a6   : > { %v1593_v33 = vpop.permute.xlu1 %1592 }
 0x6a7   : > { %1596 = vst.msk [vmem:[#allocation5] sm:$0xff] %vm1595_vm8, %v1593_v33 }
 0x6ae   : > { %v1597_v1 = vld [vmem:[#allocation5] sm:$0xff] }
 0x6af   : > { %2067 = vmatmul.mubr.msk.f32.vlgmr.msra.gmra.mxu0 %vm812_vm3, %v1597_v1 }
 0x76f   : > { %v1678_v3 = vpop.f32.mrf.mxu0 }
 0x770   : > { %v1679_v4 = vadd.f32 %v1915_v2, %v1678_v3 }
 0x771   : > { %v2068_v5 = vpop.f32.mrf.mxu0 }
 0x772   : > { %1682 = vst.msk [vmem:[%s551_s27] sm:$0xff] %vm812_vm3, %v1679_v4 }
 0x773   : > { %2476 = shalt.err (!%p2473_p5)
}
 0x774   : > { %s2477_s10 = scalar_lea.hbm %s3146_s21, 128  ;;  %s2481_s20 = scalar_lea.hbm %s3326_s6, 512 }
 0x775   : > { %p2478_p8 = scmp.ne.s32.totalorder %s3146_s21, %s2477_s10  ;;  %p2482_p3 = scmp.lt.s32.totalorder %s3146_s21, %s3326_s6 }
 0x776   : > { %p2483_p0 = scmp.lt.s32.totalorder %s2481_s20, %s2477_s10 }
 0x777   : > { %p2479_p12 = pnand %p2478_p8, %p3327_p2 }
 0x778   : > { %p2484_p4 = por %p2483_p0, %p2482_p3 }
 0x779   : > { %p2480_p13 = pneg %p2479_p12 }
 0x77b   : > { %p2485_p1 = pnand %p2484_p4, %p2480_p13 }
 0x77d   : > { %2488 = shalt.err (!%p2485_p1)
}
 0x77e   : > { %2091 = dma.vmem_to_hbm [thread:$0]  (%p3327_p2), %s1700_s12, 128, %s3146_s21, %s1684_s17  }
 0x77f PF: > { %s3328_s0 = sld [smem:[#allocation26_spill]]  ;;  %p2129_p7 = scmp.ge.s32.totalorder %s2623_s30, 2 }
 0x780   : > { %s3329_s15 = sld [smem:[#allocation36_spill]] }
 0x785   : > { %s1711_s13 = sand.u32 1, %s3328_s0  }
 0x786   : > { %p3330_p9 = scmp.ne.s32.totalorder %s3329_s15, 0  ;;  %s1712_s2 = scalar_lea.sflag [#allocation8], %s1711_s13 }
 0x788   : > { %p2117_p11 = pnand %p2129_p7, %p3330_p9 }
 0x78a   : > { %p2118_p6 = pneg %p2117_p11 }
 0x78c   : > { %2566 = dma.done.wait (%p2118_p6), %s1712_s2, 128  }
 0x78d   : > { %2568 = vsyncadd (%p2118_p6), %s1712_s2, 4294967168  ;;  %s32_s30 = sadd.s32 1, %s2623_s30   ;;  %s3332_s20 = sld [smem:[#allocation27_spill]] }
 0x78e   : > { %p3174_p10 = scmp.ge.s32.totalorder %s32_s30, 6   ;;  %s3333_s8 = sld [smem:[#allocation37_spill]] }
 0x78f   : > { %s3334_s12 = sld [smem:[#allocation31_spill]]  ;;  %s3336_s17 = smov %s2575_s18 }
 0x790   : > { %s3335_s7 = sld [smem:[#allocation33_spill]]  ;;  %s3337_s18 = smov %s2579_s19 }
 0x791   : > { %s3338_s19 = smov %s2961_s3  ;;  %s3339_s21 = smov %s2591_s22 }
 0x792   : > { %s3341_s23 = smov %s2599_s24  ;;  %s3342_s24 = smov %s2603_s25 }
 0x793   : > { %s3343_s25 = smov %s2923_s26  ;;  %s3344_s26 = smov %s2615_s28 }
 0x794   : > { %s3340_s22 = smov %s3333_s8  ;;  %s3345_s27 = smov %s2619_s29 }
 0x795   : > { %s3346_s28 = smov %s3334_s12  ;;  %31 = sbr.rel (!%p3174_p10) target bundleno = 24 (0x18), region = 162 }
 0x796   : > { %s3347_s29 = smov %s3335_s7 }
 0x79a   :  { %1717 = vsyncpa [#allocation7], 1 }
 0x79b   :  { %1719 = vsyncpa [#allocation7 + $0x1], 1 }
 0x79c   :  { %1720 = vsyncpa [#allocation10], 1 }
 0x79d   :  { %1722 = vsyncpa [#allocation10 + $0x1], 1 }
 0x79e   :  { %1723 = vsyncpa [#allocation13], 1 }
 0x79f   :  { %1724 = vsyncpa [#allocation16], 1 }
 0x7a0   :  { %1725 = vsyncpa [#allocation8], 1 }
 0x7a1   :  { %1727 = vsyncpa [#allocation8 + $0x1], 1 }

</bundles_post_ra>
